<compile_context>
chip_gen: v7x
topology: tpu7x:2x2x1
jax: 0.10.0
libtpu: 0.0.40
codegen_flags: <defaults>
</compile_context>

<pallas_src>
import functools

import jax
import jax.numpy as jnp
from jax.experimental import pallas as pl
from jax.experimental.pallas import tpu as pltpu

POOL = 4  # AvgPool2d(kernel_size=4, stride=4)
_HIGHEST = jax.lax.Precision.HIGHEST


def _shifted_eye(n, k):
    """S[r, c] = 1.0 where c == r + k; the empty border row/col encodes the
    zero 'same' padding of the 3x3 difference convs."""
    r = jax.lax.broadcasted_iota(jnp.int32, (n, n), 0)
    c = jax.lax.broadcasted_iota(jnp.int32, (n, n), 1)
    return (c == r + k).astype(jnp.float32)


def _spatial_consistency_kernel(y_ref, i_ref, ah_ref, awt_ref, out_ref,
                                py_ref, pi_ref, *,
                                bt, c, th, w, thp, hp, wp, n_tiles, fused):
    h = pl.program_id(1)
    ah = ah_ref[...]            # fused: (THp, C*TH) w/ 1/(4C); else (THp, TH) w/ 1/4
    awt = awt_ref[...]          # (W, Wp) column pooling (pre-transposed), 1/4

    def pool(ref, b):
        if fused:
            # (C, TH, W) -> (C*TH, W): layout-preserving collapse (TH % 8 == 0).
            x = ref[b].reshape(c * th, w)
            t = jnp.dot(ah, x, precision=_HIGHEST,
                        preferred_element_type=jnp.float32)          # (THp, W)
        else:
            acc = ref[b, 0]
            for ci in range(1, c):
                acc = acc + ref[b, ci]
            t = jnp.dot(ah, acc * (1.0 / c), precision=_HIGHEST,
                        preferred_element_type=jnp.float32)          # (THp, W)
        return jnp.dot(t, awt, precision=_HIGHEST,
                       preferred_element_type=jnp.float32)           # (THp, Wp)

    if n_tiles == 1:
        for b in range(bt):
            py_ref[b] = pool(y_ref, b)
            pi_ref[b] = pool(i_ref, b)
    else:
        # Row-tiled path: bt == 1, store this tile's pooled rows into scratch.
        row0 = h * thp
        if thp % 8 == 0:
            row0 = pl.multiple_of(row0, 8)
        py_ref[0, pl.ds(row0, thp), :] = pool(y_ref, 0)
        pi_ref[0, pl.ds(row0, thp), :] = pool(i_ref, 0)

    def epilogue():
        s_left = _shifted_eye(wp, 1)     # P @ S -> neighbour at j-1 (0 at j=0)
        s_right = _shifted_eye(wp, -1)   # P @ S -> neighbour at j+1 (0 at j=Wp-1)
        s_up = _shifted_eye(hp, -1)      # S @ P -> neighbour at i-1 (0 at i=0)
        s_down = _shifted_eye(hp, 1)     # S @ P -> neighbour at i+1 (0 at i=Hp-1)
        inv_n = 1.0 / (hp * wp)
        for b in range(bt):
            p_y = py_ref[b]              # (Hp, Wp)
            p_i = pi_ref[b]

            def col_term(s):
                dy = p_y - jnp.dot(p_y, s, precision=_HIGHEST,
                                   preferred_element_type=jnp.float32)
                di = p_i - jnp.dot(p_i, s, precision=_HIGHEST,
                                   preferred_element_type=jnp.float32)
                d = jnp.abs(dy) - jnp.abs(di)
                return d * d

            def row_term(s):
                dy = p_y - jnp.dot(s, p_y, precision=_HIGHEST,
                                   preferred_element_type=jnp.float32)
                di = p_i - jnp.dot(s, p_i, precision=_HIGHEST,
                                   preferred_element_type=jnp.float32)
                d = jnp.abs(dy) - jnp.abs(di)
                return d * d

            # One direction at a time -> bounded live temporaries.
            total = col_term(s_left)
            total = total + col_term(s_right)
            total = total + row_term(s_up)
            total = total + row_term(s_down)
            loss_b = jnp.sum(total) * inv_n
            out_ref[b] = jnp.full((1, 128), loss_b, dtype=jnp.float32)

    if n_tiles == 1:
        epilogue()
    else:
        pl.when(h == n_tiles - 1)(epilogue)


def _tpu_vmem_capacity_bytes():
    try:
        info = pltpu.get_tpu_info()
        cap = getattr(info, "vmem_capacity_bytes", None)
        if cap is not None:
            return int(cap)
    except Exception:
        pass
    return 64 << 20  # conservative (v7x-class) fallback


def _pick_row_tile(H, W, C, budget_bytes, max_rows=512):
    """Full H if it fits; else the largest multiple-of-32 (then -8) divisor of H
    within the budget and <= max_rows (keeps HIGHEST-precision pooling matmuls
    comfortably below the HBM roofline on every generation)."""
    per_row = 2 * 2 * C * W * 4            # Y + I, double-buffered, f32
    if H * per_row <= budget_bytes:
        return H
    cap = max(POOL, min(budget_bytes // per_row, max_rows, H))
    for align in (32, 8):
        th = (cap // align) * align
        while th >= align:
            if H % th == 0:
                return th
            th -= align
    # TODO(synk): ragged last row tile (cdiv grid + masked pooling) for H with
    # no suitable divisor; currently falls back to full-height tiles.
    return H


def _pick_batch_tile(B, C, H, W, budget_bytes, th):
    """Process Bt images per grid step when whole images fit the budget, but
    keep >=2 steps on the parallel batch axis (feeds both v7x TensorCores)."""
    if th != H or B < 2:
        return 1
    per_img = 2 * 2 * C * H * W * 4        # Y + I, double-buffered, f32
    cap = int(min(max(budget_bytes // per_img, 1), 8, max(B // 2, 1)))
    bt = 1
    for d in range(1, cap + 1):
        if B % d == 0:
            bt = d
    return bt


def spatial_consistency_loss(Y, I):
    assert Y.shape == I.shape
    B, C, H, W = Y.shape
    assert H % POOL == 0 and W % POOL == 0
    Hp, Wp = H // POOL, W // POOL

    # Generation-aware budgets (v5e/v6e: 128 MiB VMEM, v7x: 64 MiB).
    vmem_cap = _tpu_vmem_capacity_bytes()
    if vmem_cap >= (96 << 20):
        tile_budget, limit_cap = 56 << 20, 100 << 20
    else:
        tile_budget, limit_cap = 24 << 20, 56 << 20

    TH = _pick_row_tile(H, W, C, tile_budget)
    THp = TH // POOL
    n_row_tiles = H // TH
    Bt = _pick_batch_tile(B, C, H, W, tile_budget, TH)
    fused = (TH % 8 == 0)

    # Pooling matrices.
    if fused:
        # (THp, C*TH): one matmul does channel mean (1/C) + 4-row pooling (1/4).
        k = jnp.arange(C * TH) % TH
        ah = ((k[None, :] // POOL) == jnp.arange(THp)[:, None]
              ).astype(jnp.float32) * (1.0 / (POOL * C))
    else:
        ah = ((jnp.arange(TH)[None, :] // POOL) == jnp.arange(THp)[:, None]
              ).astype(jnp.float32) * (1.0 / POOL)
    awt = ((jnp.arange(W)[:, None] // POOL) == jnp.arange(Wp)[None, :]
           ).astype(jnp.float32) * (1.0 / POOL)

    kernel = functools.partial(
        _spatial_consistency_kernel,
        bt=Bt, c=C, th=TH, w=W, thp=THp, hp=Hp, wp=Wp,
        n_tiles=n_row_tiles, fused=fused)

    # VMEM estimate incl. epilogue temporaries + output block, with headroom.
    est_f32 = (2 * 2 * Bt * C * TH * W            # Y/I tiles, double-buffered
               + 2 * (int(ah.size) + int(awt.size))
               + 2 * Bt * Hp * Wp                 # pooled-map scratch
               + 2 * Bt * 128                     # output block
               + 2 * (Hp * Hp + Wp * Wp)          # shift matrices
               + 8 * Hp * Wp)                     # epilogue map temporaries
    vmem_limit = int(min(max(4 * est_f32 + (8 << 20), 32 << 20), limit_cap))

    out = pl.pallas_call(
        kernel,
        out_shape=jax.ShapeDtypeStruct((B, 1, 128), jnp.float32),
        grid_spec=pltpu.PrefetchScalarGridSpec(
            num_scalar_prefetch=0,
            grid=(B // Bt, n_row_tiles),
            in_specs=[
                pl.BlockSpec((Bt, C, TH, W), lambda b, h: (b, 0, h, 0)),
                pl.BlockSpec((Bt, C, TH, W), lambda b, h: (b, 0, h, 0)),
                pl.BlockSpec(tuple(ah.shape), lambda b, h: (0, 0)),
                pl.BlockSpec(tuple(awt.shape), lambda b, h: (0, 0)),
            ],
            out_specs=pl.BlockSpec((Bt, 1, 128), lambda b, h: (b, 0, 0)),
            scratch_shapes=[
                pltpu.VMEM((Bt, Hp, Wp), jnp.float32),   # pooled Y
                pltpu.VMEM((Bt, Hp, Wp), jnp.float32),   # pooled I
            ],
        ),
        compiler_params=pltpu.CompilerParams(
            dimension_semantics=("parallel", "arbitrary"),
            vmem_limit_bytes=vmem_limit,
        ),
    )(Y, I, ah, awt)
    # Mean of per-image means == global mean (every image has Hp*Wp elements).
    return jnp.mean(out[:, 0, 0])


def spatial_consistency_loss_ref(Y, I):
    """Pure-JAX reference matching the PyTorch module."""
    yl = jnp.mean(Y, axis=1)
    il = jnp.mean(I, axis=1)
    B, H, W = yl.shape
    yp = yl.reshape(B, H // POOL, POOL, W // POOL, POOL).mean(axis=(2, 4))
    ip = il.reshape(B, H // POOL, POOL, W // POOL, POOL).mean(axis=(2, 4))

    def grads(p):
        left = p - jnp.pad(p, ((0, 0), (0, 0), (1, 0)))[:, :, :-1]
        right = p - jnp.pad(p, ((0, 0), (0, 0), (0, 1)))[:, :, 1:]
        up = p - jnp.pad(p, ((0, 0), (1, 0), (0, 0)))[:, :-1, :]
        down = p - jnp.pad(p, ((0, 0), (0, 1), (0, 0)))[:, 1:, :]
        return left, right, up, down

    yl_, yr_, yu_, yd_ = grads(yp)
    il_, ir_, iu_, idn = grads(ip)
    total = ((jnp.abs(yl_) - jnp.abs(il_)) ** 2
             + (jnp.abs(yr_) - jnp.abs(ir_)) ** 2
             + (jnp.abs(yu_) - jnp.abs(iu_)) ** 2
             + (jnp.abs(yd_) - jnp.abs(idn)) ** 2)
    return jnp.mean(total)


if __name__ == "__main__":
    key = jax.random.PRNGKey(0)
    k1, k2 = jax.random.split(key)
    B, C, H, W = 2, 3, 32, 32            # pooled maps are 8x8 per image
    Y = jax.random.uniform(k1, (B, C, H, W), dtype=jnp.float32)
    I = jax.random.uniform(k2, (B, C, H, W), dtype=jnp.float32)

    loss = spatial_consistency_loss(Y, I)
    loss = jax.block_until_ready(loss)

    ref = spatial_consistency_loss_ref(Y, I)
    assert jnp.allclose(loss, ref, rtol=1e-4, atol=1e-6), (loss, ref)
    print("KERNEL_OK")
</pallas_src>

<mosaic_0001>
module attributes {stable_mosaic.version = 11 : i64} {
  func.func @_spatial_consistency_kernel(%arg0: i32, %arg1: i32, %arg2: memref<1x3x32x32xf32, #tpu.memory_space<vmem>>, %arg3: memref<1x3x32x32xf32, #tpu.memory_space<vmem>>, %arg4: memref<8x96xf32, #tpu.memory_space<vmem>>, %arg5: memref<32x8xf32, #tpu.memory_space<vmem>>, %arg6: memref<1x1x128xf32, #tpu.memory_space<vmem>>, %arg7: memref<1x8x8xf32, #tpu.memory_space<vmem>>, %arg8: memref<1x8x8xf32, #tpu.memory_space<vmem>>) attributes {dimension_semantics = [#tpu.dimension_semantics<parallel>, #tpu.dimension_semantics<arbitrary>], iteration_bounds = array<i64: 2, 1>, scalar_prefetch = 0 : i64, scratch_operands = 2 : i64, tpu.core_type = #tpu.core_type<tc>, window_params = [{transform_indices = @transform_0, window_bounds = array<i64: 1, 3, 32, 32>}, {transform_indices = @transform_1, window_bounds = array<i64: 1, 3, 32, 32>}, {pipeline_mode = #tpu.pipeline_mode<synchronous>, transform_indices = @transform_2, window_bounds = array<i64: 8, 96>}, {pipeline_mode = #tpu.pipeline_mode<synchronous>, transform_indices = @transform_3, window_bounds = array<i64: 32, 8>}, {transform_indices = @transform_4, window_bounds = array<i64: 1, 1, 128>}]} {
    %c0 = arith.constant 0 : index
    %c0_0 = arith.constant 0 : index
    %0 = vector.load %arg4[%c0, %c0_0] : memref<8x96xf32, #tpu.memory_space<vmem>>, vector<8x96xf32>
    %c0_1 = arith.constant 0 : index
    %c0_2 = arith.constant 0 : index
    %1 = vector.load %arg5[%c0_1, %c0_2] : memref<32x8xf32, #tpu.memory_space<vmem>>, vector<32x8xf32>
    %c0_3 = arith.constant 0 : index
    %c0_4 = arith.constant 0 : index
    %c0_5 = arith.constant 0 : index
    %c0_6 = arith.constant 0 : index
    %2 = vector.load %arg2[%c0_3, %c0_4, %c0_5, %c0_6] : memref<1x3x32x32xf32, #tpu.memory_space<vmem>>, vector<1x3x32x32xf32>
    %3 = vector.shape_cast %2 : vector<1x3x32x32xf32> to vector<3x32x32xf32>
    %4 = vector.shape_cast %3 : vector<3x32x32xf32> to vector<96x32xf32>
    %cst = arith.constant dense<0.000000e+00> : vector<8x32xf32>
    %5 = tpu.matmul %0, %4, %cst {dimension_numbers = #tpu.dot_dimension_numbers<[1], [0], [0], [1], [0, 0, 1, 1], [], []>, precision = #tpu.contract_precision<fp32>} : vector<8x96xf32>, vector<96x32xf32>, vector<8x32xf32> -> vector<8x32xf32>
    %cst_7 = arith.constant dense<0.000000e+00> : vector<8x8xf32>
    %6 = tpu.matmul %5, %1, %cst_7 {dimension_numbers = #tpu.dot_dimension_numbers<[1], [0], [0], [1], [0, 0, 1, 1], [], []>, precision = #tpu.contract_precision<fp32>} : vector<8x32xf32>, vector<32x8xf32>, vector<8x8xf32> -> vector<8x8xf32>
    %c0_8 = arith.constant 0 : index
    %c0_9 = arith.constant 0 : index
    %c0_10 = arith.constant 0 : index
    %7 = vector.load %arg7[%c0_8, %c0_9, %c0_10] : memref<1x8x8xf32, #tpu.memory_space<vmem>>, vector<1x8x8xf32>
    %8 = vector.shape_cast %7 : vector<1x8x8xf32> to vector<8x8xf32>
    %9 = vector.shape_cast %6 : vector<8x8xf32> to vector<1x8x8xf32>
    tpu.vector_store %arg7[%c0_8, %c0_9, %c0_10], %9 {strides = array<i32>} : memref<1x8x8xf32, #tpu.memory_space<vmem>>, vector<1x8x8xf32>,
    %c0_11 = arith.constant 0 : index
    %c0_12 = arith.constant 0 : index
    %c0_13 = arith.constant 0 : index
    %c0_14 = arith.constant 0 : index
    %10 = vector.load %arg3[%c0_11, %c0_12, %c0_13, %c0_14] : memref<1x3x32x32xf32, #tpu.memory_space<vmem>>, vector<1x3x32x32xf32>
    %11 = vector.shape_cast %10 : vector<1x3x32x32xf32> to vector<3x32x32xf32>
    %12 = vector.shape_cast %11 : vector<3x32x32xf32> to vector<96x32xf32>
    %cst_15 = arith.constant dense<0.000000e+00> : vector<8x32xf32>
    %13 = tpu.matmul %0, %12, %cst_15 {dimension_numbers = #tpu.dot_dimension_numbers<[1], [0], [0], [1], [0, 0, 1, 1], [], []>, precision = #tpu.contract_precision<fp32>} : vector<8x96xf32>, vector<96x32xf32>, vector<8x32xf32> -> vector<8x32xf32>
    %cst_16 = arith.constant dense<0.000000e+00> : vector<8x8xf32>
    %14 = tpu.matmul %13, %1, %cst_16 {dimension_numbers = #tpu.dot_dimension_numbers<[1], [0], [0], [1], [0, 0, 1, 1], [], []>, precision = #tpu.contract_precision<fp32>} : vector<8x32xf32>, vector<32x8xf32>, vector<8x8xf32> -> vector<8x8xf32>
    %c0_17 = arith.constant 0 : index
    %c0_18 = arith.constant 0 : index
    %c0_19 = arith.constant 0 : index
    %15 = vector.load %arg8[%c0_17, %c0_18, %c0_19] : memref<1x8x8xf32, #tpu.memory_space<vmem>>, vector<1x8x8xf32>
    %16 = vector.shape_cast %15 : vector<1x8x8xf32> to vector<8x8xf32>
    %17 = vector.shape_cast %14 : vector<8x8xf32> to vector<1x8x8xf32>
    tpu.vector_store %arg8[%c0_17, %c0_18, %c0_19], %17 {strides = array<i32>} : memref<1x8x8xf32, #tpu.memory_space<vmem>>, vector<1x8x8xf32>,
    %18 = tpu.iota {dimensions = array<i32: 0>} : vector<8x8xi32>
    %19 = tpu.iota {dimensions = array<i32: 1>} : vector<8x8xi32>
    %c1_i32 = arith.constant 1 : i32
    %20 = vector.broadcast %c1_i32 : i32 to vector<8x8xi32>
    %21 = arith.addi %18, %20 : vector<8x8xi32>
    %22 = arith.cmpi eq, %19, %21 : vector<8x8xi32>
    %23 = arith.extui %22 : vector<8x8xi1> to vector<8x8xi32>
    %24 = arith.sitofp %23 : vector<8x8xi32> to vector<8x8xf32>
    %25 = tpu.iota {dimensions = array<i32: 0>} : vector<8x8xi32>
    %26 = tpu.iota {dimensions = array<i32: 1>} : vector<8x8xi32>
    %c-1_i32 = arith.constant -1 : i32
    %27 = vector.broadcast %c-1_i32 : i32 to vector<8x8xi32>
    %28 = arith.addi %25, %27 : vector<8x8xi32>
    %29 = arith.cmpi eq, %26, %28 : vector<8x8xi32>
    %30 = arith.extui %29 : vector<8x8xi1> to vector<8x8xi32>
    %31 = arith.sitofp %30 : vector<8x8xi32> to vector<8x8xf32>
    %32 = tpu.iota {dimensions = array<i32: 0>} : vector<8x8xi32>
    %33 = tpu.iota {dimensions = array<i32: 1>} : vector<8x8xi32>
    %c-1_i32_20 = arith.constant -1 : i32
    %34 = vector.broadcast %c-1_i32_20 : i32 to vector<8x8xi32>
    %35 = arith.addi %32, %34 : vector<8x8xi32>
    %36 = arith.cmpi eq, %33, %35 : vector<8x8xi32>
    %37 = arith.extui %36 : vector<8x8xi1> to vector<8x8xi32>
    %38 = arith.sitofp %37 : vector<8x8xi32> to vector<8x8xf32>
    %39 = tpu.iota {dimensions = array<i32: 0>} : vector<8x8xi32>
    %40 = tpu.iota {dimensions = array<i32: 1>} : vector<8x8xi32>
    %c1_i32_21 = arith.constant 1 : i32
    %41 = vector.broadcast %c1_i32_21 : i32 to vector<8x8xi32>
    %42 = arith.addi %39, %41 : vector<8x8xi32>
    %43 = arith.cmpi eq, %40, %42 : vector<8x8xi32>
    %44 = arith.extui %43 : vector<8x8xi1> to vector<8x8xi32>
    %45 = arith.sitofp %44 : vector<8x8xi32> to vector<8x8xf32>
    %c0_22 = arith.constant 0 : index
    %c0_23 = arith.constant 0 : index
    %c0_24 = arith.constant 0 : index
    %46 = vector.load %arg7[%c0_22, %c0_23, %c0_24] : memref<1x8x8xf32, #tpu.memory_space<vmem>>, vector<1x8x8xf32>
    %47 = vector.shape_cast %46 : vector<1x8x8xf32> to vector<8x8xf32>
    %c0_25 = arith.constant 0 : index
    %c0_26 = arith.constant 0 : index
    %c0_27 = arith.constant 0 : index
    %48 = vector.load %arg8[%c0_25, %c0_26, %c0_27] : memref<1x8x8xf32, #tpu.memory_space<vmem>>, vector<1x8x8xf32>
    %49 = vector.shape_cast %48 : vector<1x8x8xf32> to vector<8x8xf32>
    %cst_28 = arith.constant dense<0.000000e+00> : vector<8x8xf32>
    %50 = tpu.matmul %47, %24, %cst_28 {dimension_numbers = #tpu.dot_dimension_numbers<[1], [0], [0], [1], [0, 0, 1, 1], [], []>, precision = #tpu.contract_precision<fp32>} : vector<8x8xf32>, vector<8x8xf32>, vector<8x8xf32> -> vector<8x8xf32>
    %51 = arith.subf %47, %50 : vector<8x8xf32>
    %cst_29 = arith.constant dense<0.000000e+00> : vector<8x8xf32>
    %52 = tpu.matmul %49, %24, %cst_29 {dimension_numbers = #tpu.dot_dimension_numbers<[1], [0], [0], [1], [0, 0, 1, 1], [], []>, precision = #tpu.contract_precision<fp32>} : vector<8x8xf32>, vector<8x8xf32>, vector<8x8xf32> -> vector<8x8xf32>
    %53 = arith.subf %49, %52 : vector<8x8xf32>
    %54 = math.absf %51 : vector<8x8xf32>
    %55 = math.absf %53 : vector<8x8xf32>
    %56 = arith.subf %54, %55 : vector<8x8xf32>
    %57 = arith.mulf %56, %56 : vector<8x8xf32>
    %cst_30 = arith.constant dense<0.000000e+00> : vector<8x8xf32>
    %58 = tpu.matmul %47, %31, %cst_30 {dimension_numbers = #tpu.dot_dimension_numbers<[1], [0], [0], [1], [0, 0, 1, 1], [], []>, precision = #tpu.contract_precision<fp32>} : vector<8x8xf32>, vector<8x8xf32>, vector<8x8xf32> -> vector<8x8xf32>
    %59 = arith.subf %47, %58 : vector<8x8xf32>
    %cst_31 = arith.constant dense<0.000000e+00> : vector<8x8xf32>
    %60 = tpu.matmul %49, %31, %cst_31 {dimension_numbers = #tpu.dot_dimension_numbers<[1], [0], [0], [1], [0, 0, 1, 1], [], []>, precision = #tpu.contract_precision<fp32>} : vector<8x8xf32>, vector<8x8xf32>, vector<8x8xf32> -> vector<8x8xf32>
    %61 = arith.subf %49, %60 : vector<8x8xf32>
    %62 = math.absf %59 : vector<8x8xf32>
    %63 = math.absf %61 : vector<8x8xf32>
    %64 = arith.subf %62, %63 : vector<8x8xf32>
    %65 = arith.mulf %64, %64 : vector<8x8xf32>
    %66 = arith.addf %57, %65 : vector<8x8xf32>
    %cst_32 = arith.constant dense<0.000000e+00> : vector<8x8xf32>
    %67 = tpu.matmul %38, %47, %cst_32 {dimension_numbers = #tpu.dot_dimension_numbers<[1], [0], [0], [1], [0, 0, 1, 1], [], []>, precision = #tpu.contract_precision<fp32>} : vector<8x8xf32>, vector<8x8xf32>, vector<8x8xf32> -> vector<8x8xf32>
    %68 = arith.subf %47, %67 : vector<8x8xf32>
    %cst_33 = arith.constant dense<0.000000e+00> : vector<8x8xf32>
    %69 = tpu.matmul %38, %49, %cst_33 {dimension_numbers = #tpu.dot_dimension_numbers<[1], [0], [0], [1], [0, 0, 1, 1], [], []>, precision = #tpu.contract_precision<fp32>} : vector<8x8xf32>, vector<8x8xf32>, vector<8x8xf32> -> vector<8x8xf32>
    %70 = arith.subf %49, %69 : vector<8x8xf32>
    %71 = math.absf %68 : vector<8x8xf32>
    %72 = math.absf %70 : vector<8x8xf32>
    %73 = arith.subf %71, %72 : vector<8x8xf32>
    %74 = arith.mulf %73, %73 : vector<8x8xf32>
    %75 = arith.addf %66, %74 : vector<8x8xf32>
    %cst_34 = arith.constant dense<0.000000e+00> : vector<8x8xf32>
    %76 = tpu.matmul %45, %47, %cst_34 {dimension_numbers = #tpu.dot_dimension_numbers<[1], [0], [0], [1], [0, 0, 1, 1], [], []>, precision = #tpu.contract_precision<fp32>} : vector<8x8xf32>, vector<8x8xf32>, vector<8x8xf32> -> vector<8x8xf32>
    %77 = arith.subf %47, %76 : vector<8x8xf32>
    %cst_35 = arith.constant dense<0.000000e+00> : vector<8x8xf32>
    %78 = tpu.matmul %45, %49, %cst_35 {dimension_numbers = #tpu.dot_dimension_numbers<[1], [0], [0], [1], [0, 0, 1, 1], [], []>, precision = #tpu.contract_precision<fp32>} : vector<8x8xf32>, vector<8x8xf32>, vector<8x8xf32> -> vector<8x8xf32>
    %79 = arith.subf %49, %78 : vector<8x8xf32>
    %80 = math.absf %77 : vector<8x8xf32>
    %81 = math.absf %79 : vector<8x8xf32>
    %82 = arith.subf %80, %81 : vector<8x8xf32>
    %83 = arith.mulf %82, %82 : vector<8x8xf32>
    %84 = arith.addf %75, %83 : vector<8x8xf32>
    %85 = vector.shape_cast %84 : vector<8x8xf32> to vector<1x8x8xf32>
    %cst_36 = arith.constant dense<0.000000e+00> : vector<1xf32>
    %86 = vector.multi_reduction <add>, %85, %cst_36 [1, 2] : vector<1x8x8xf32> to vector<1xf32>
    %87 = vector.shape_cast %86 : vector<1xf32> to vector<1x1x1xf32>
    %88 = vector.extract %87[0, 0, 0] : f32 from vector<1x1x1xf32>
    %cst_37 = arith.constant 1.562500e-02 : f32
    %89 = arith.mulf %88, %cst_37 : f32
    %90 = vector.broadcast %89 : f32 to vector<1x128xf32>
    %c0_38 = arith.constant 0 : index
    %c0_39 = arith.constant 0 : index
    %c0_40 = arith.constant 0 : index
    %91 = vector.load %arg6[%c0_38, %c0_39, %c0_40] : memref<1x1x128xf32, #tpu.memory_space<vmem>>, vector<1x1x128xf32>
    %92 = vector.shape_cast %91 : vector<1x1x128xf32> to vector<1x128xf32>
    %93 = vector.shape_cast %90 : vector<1x128xf32> to vector<1x1x128xf32>
    tpu.vector_store %arg6[%c0_38, %c0_39, %c0_40], %93 {strides = array<i32>} : memref<1x1x128xf32, #tpu.memory_space<vmem>>, vector<1x1x128xf32>,
    return
  }
  func.func @transform_0(%arg0: i32, %arg1: i32) -> (i32, i32, i32, i32) {
    %c0_i32 = arith.constant 0 : i32
    %c0_i32_0 = arith.constant 0 : i32
    %c0_i32_1 = arith.constant 0 : i32
    return %arg0, %c0_i32, %arg1, %c0_i32_0 : i32, i32, i32, i32
  }
  func.func @transform_1(%arg0: i32, %arg1: i32) -> (i32, i32, i32, i32) {
    %c0_i32 = arith.constant 0 : i32
    %c0_i32_0 = arith.constant 0 : i32
    %c0_i32_1 = arith.constant 0 : i32
    return %arg0, %c0_i32, %arg1, %c0_i32_0 : i32, i32, i32, i32
  }
  func.func @transform_2(%arg0: i32, %arg1: i32) -> (i32, i32) {
    %c0_i32 = arith.constant 0 : i32
    %c0_i32_0 = arith.constant 0 : i32
    %c0_i32_1 = arith.constant 0 : i32
    return %c0_i32, %c0_i32_0 : i32, i32
  }
  func.func @transform_3(%arg0: i32, %arg1: i32) -> (i32, i32) {
    %c0_i32 = arith.constant 0 : i32
    %c0_i32_0 = arith.constant 0 : i32
    %c0_i32_1 = arith.constant 0 : i32
    return %c0_i32, %c0_i32_0 : i32, i32
  }
  func.func @transform_4(%arg0: i32, %arg1: i32) -> (i32, i32, i32) {
    %c0_i32 = arith.constant 0 : i32
    %c0_i32_0 = arith.constant 0 : i32
    %c0_i32_1 = arith.constant 0 : i32
    return %arg0, %c0_i32, %c0_i32_0 : i32, i32, i32
  }
}

</mosaic_0001>

<bundles_post_ra>
// kernel: tpu_custom_call.1
= control target key start
LH: loop header
LB: loop body
LE: loop exit
PB: predicated region body
PF: predicated region fallthrough
CT: control target
= control target key end

     0   :  { %9 = vsyncpa [#allocation5], 0  ;;  %s9000_s0 = inlined_call_operand.hbm [shape: f32[2,3,32,32], index: 0, kind: input, shape index: {}]   ;;  %s9001_s1 = inlined_call_operand.hbm [shape: f32[2,3,32,32], index: 1, kind: input, shape index: {}]   ;;  %s9002_s2 = inlined_call_operand.vmem [shape: f32[8,96], index: 2, kind: input, shape index: {}]   ;;  %s9003_s3 = inlined_call_operand.vmem [shape: f32[32,8], index: 3, kind: input, shape index: {}]   ;;  %s9004_s4 = inlined_call_operand.hbm [shape: f32[2,1,128], index: 4, kind: output, shape index: {}]  }
   0x1   :  { %11 = vsyncpa [#allocation5 + $0x1], 0 }
   0x2   :  { %12 = vsyncpa [#allocation8], 0 }
   0x3   :  { %14 = vsyncpa [#allocation8 + $0x1], 0 }
   0x4   :  { %15 = vsyncpa [#allocation6], 0 }
   0x5   :  { %17 = vsyncpa [#allocation6 + $0x1], 0  ;;  %s7929_s15 = smov 0   ;;  %s7931_s16 = smov 0  }
   0x6   :  { %s7933_s17 = smov 0   ;;  %s7935_s18 = smov 0  }
   0x7   :  { %s7937_s19 = smov 0   ;;  %s7939_s20 = smov 0  }
   0x8 LB: > { %s6215_s21 = sadd.s32 4294967295, %s7893_s20   ;;  %s6216_s22 = sadd.s32 4294967294, %s7893_s20   ;;  %s7893_s20 = sphi %s7939_s20, %s23_s20   ;;  %s7889_s19 = sphi %s7937_s19, %s9028_s19   ;;  %s7885_s18 = sphi %s7935_s18, %s9027_s18   ;;  %s7881_s17 = sphi %s7933_s17, %s9026_s17   ;;  %s7877_s16 = sphi %s7931_s16, %s9025_s16   ;;  %s7873_s15 = sphi %s7929_s15, %s9024_s15  }
   0x9   : > { %s35_s23 = sadd.s32 1, %s7889_s19  ;;  %s44_s24 = sadd.s32 1, %s7881_s17 }
   0xa   : > { %p37_p0 = scmp.ge.s32.totalorder %s35_s23, 2  ;;  %p51_p1 = scmp.ne.s32.totalorder %s7881_s17, %s7877_s16 }
   0xb   : > { %p52_p2 = scmp.eq.s32.totalorder %s7893_s20, 0  ;;  %p57_p3 = scmp.ne.s32.totalorder %s7877_s16, %s7873_s15 }
   0xc   : > { %s9030_s23 = smov (%p37_p0, %s35_s23), 0  ;;  %p58_p5 = scmp.eq.s32.totalorder %s6215_s21, 0 }
   0xd   : > { %p7970_p4 = por %p52_p2, %p51_p1  ;;  %s39_s26 = ssub.s32 %s7889_s19, %s9030_s23 }
   0xe   : > { %p151_p6 = scmp.eq.s32.totalorder %s6215_s21, 1  ;;  %p42_p7 = scmp.eq.s32.totalorder %s39_s26, 0 }
   0xf   : > { %p7976_p8 = por %p58_p5, %p57_p3  ;;  %p157_p10 = scmp.eq.s32.totalorder %s6216_s22, 1 }
  0x10   : > { %p7980_p9 = por %p151_p6, %p51_p1  ;;  %p7691_p13 = scmp.lt.s32.totalorder %s7893_s20, 2 }
  0x11   : > { %s9009_s27 = scalar_select %p7976_p8, 1, 0 }
  0x12   : > { %s9010_s28 = scalar_select %p7980_p9, 1, 0 }
  0x13   : > { %s7985_s29 = scalar_select %p42_p7, %s7881_s17, %s44_s24  }
  0x14   : > { %p7987_p11 = por %p157_p10, %p57_p3  ;;  %s7994_s5 = sand.u32 1, %s7881_s17  }
  0x15   : > { %s7667_s6 = smul.u32 96, %s7994_s5  ;;  %p8000_p0 = pnand %p7691_p13, %p7970_p4 }
  0x16   : > { %s9011_s30 = scalar_select %p7987_p11, 1, 0 }
  0x17   : > { %s7668_s7 = smul.u32 1536, %s7889_s19  ;;  %s187_s12 = scalar_lea.vmem [#allocation4], %s7667_s6 }
  0x18   : > { %s196_s13 = sshll.u32 %s187_s12, 4  ;;  %s184_s14 = scalar_lea.sflag [#allocation5], %s7994_s5  ;;  %s8013_s13 = int_to_ptr.vmem [resolvable:$true] %s196_s13 }
  0x19   : > { %s8009_s11 = scalar_lea.hbm %s9000_s0, %s7668_s7  ;;  %p7749_p3 = pneg %p8000_p0 }
  0x1a   : > { %s7747_s21 = scalar_lea.hbm %s8009_s11, 1536  ;;  %s7752_s25 = scalar_lea.hbm %s9000_s0, 3072 }
  0x1b   : > { %p7748_p2 = scmp.ne.s32.totalorder %s8009_s11, %s7747_s21  ;;  %p7753_p6 = scmp.lt.u32.totalorder %s8009_s11, %s9000_s0 }
  0x1c   : > { %p7754_p7 = scmp.lt.u32.totalorder %s7752_s25, %s7747_s21  ;;  %p7756_p13 = scmp.lt.u32.totalorder %s7747_s21, %s8009_s11 }
  0x1d   : > { %p7750_p4 = pnand %p7749_p3, %p7748_p2 }
  0x1e   : > { %p7755_p10 = por %p7754_p7, %p7753_p6 }
  0x1f   : > { %p7751_p5 = pneg %p7750_p4 }
  0x20   : > { %p7757_p12 = por %p7756_p13, %p7755_p10 }
  0x22   : > { %p7758_p1 = pnand %p7757_p12, %p7751_p5 }
  0x24   : > { %7761 = shalt.err (!%p7758_p1)
}
  0x25   : > { %s7762_s10 = scalar_lea.vmem %s8013_s13, 1536  ;;  %s7895_s12 = smov [#allocation4]  }
  0x26   : > { %p7763_p2 = scmp.ne.s32.totalorder %s8013_s13, %s7762_s10  ;;  %s7767_s22 = sshll.u32 %s7895_s12, 4  ;;  %s7768_s22 = int_to_ptr.vmem [resolvable:$false] %s7767_s22 }
  0x27   : > { %s7769_s24 = scalar_lea.vmem %s7768_s22, 3072  ;;  %p7770_p9 = scmp.lt.s32.totalorder %s8013_s13, %s7768_s22 }
  0x28   : > { %p7765_p4 = pnand %p7763_p2, %p7749_p3  ;;  %p7771_p6 = scmp.lt.s32.totalorder %s7769_s24, %s7762_s10 }
  0x2a   : > { %p7766_p11 = pneg %p7765_p4  ;;  %p7772_p7 = por %p7771_p6, %p7770_p9 }
  0x2c   : > { %p7773_p10 = pnand %p7772_p7, %p7766_p11 }
  0x2e   : > { %7776 = shalt.err (!%p7773_p10)
}
  0x2f   : > { %s9006_s21 = smov 128   ;;  %s7897_s25 = smov 8  }
  0x30   : > { %7683 = dma.hbm_to_vmem [thread:$0]  (!%p8000_p0), %s8009_s11, 1536, %s8013_s13, %s184_s14, %s9006_s21, %s9006_s21, %s7897_s25  }
  0x31   : > { %p227_p9 = scmp.lt.s32.totalorder %s7893_s20, 3  ;;  %s8053_s10 = scalar_lea.hbm %s9001_s1, %s7668_s7 }
  0x32   : > { %p9013_p11 = scmp.ge.s32.totalorder %s7893_s20, 1  ;;  %s210_s22 = scalar_lea.vmem [#allocation7], %s7667_s6 }
  0x33   : > { %s219_s24 = sshll.u32 %s210_s22, 4  ;;  %s207_s11 = scalar_lea.sflag [#allocation8], %s7994_s5  ;;  %s8063_s24 = int_to_ptr.vmem [resolvable:$true] %s219_s24 }
  0x34   : > { %p8057_p12 = pnand %p9013_p11, %p227_p9  ;;  %s7777_s13 = scalar_lea.hbm %s8053_s10, 1536 }
  0x35   : > { %p7778_p1 = scmp.ne.s32.totalorder %s8053_s10, %s7777_s13  ;;  %s7782_s26 = scalar_lea.hbm %s9001_s1, 3072 }
  0x36   : > { %p7783_p2 = scmp.lt.u32.totalorder %s8053_s10, %s9001_s1  ;;  %p7784_p4 = scmp.lt.u32.totalorder %s7782_s26, %s7777_s13 }
  0x37   : > { %p7780_p5 = pnand %p7778_p1, %p7749_p3  ;;  %p7786_p7 = scmp.lt.u32.totalorder %s7777_s13, %s8053_s10 }
  0x38   : > { %p7785_p6 = por %p7784_p4, %p7783_p2 }
  0x39   : > { %p7781_p13 = pneg %p7780_p5 }
  0x3a   : > { %p7787_p10 = por %p7786_p7, %p7785_p6 }
  0x3c   : > { %p7788_p9 = pnand %p7787_p10, %p7781_p13 }
  0x3e   : > { %7791 = shalt.err (!%p7788_p9)
}
  0x3f   : > { %s7792_s6 = scalar_lea.vmem %s8063_s24, 1536  ;;  %s7898_s22 = smov [#allocation7]  }
  0x40   : > { %p7793_p11 = scmp.ne.s32.totalorder %s8063_s24, %s7792_s6  ;;  %s7797_s7 = sshll.u32 %s7898_s22, 4  ;;  %s7798_s7 = int_to_ptr.vmem [resolvable:$false] %s7797_s7 }
  0x41   : > { %s7799_s21 = scalar_lea.vmem %s7798_s7, 3072  ;;  %p7800_p8 = scmp.lt.s32.totalorder %s8063_s24, %s7798_s7 }
  0x42   : > { %p7795_p1 = pnand %p7793_p11, %p7749_p3  ;;  %p7801_p2 = scmp.lt.s32.totalorder %s7799_s21, %s7792_s6 }
  0x44   : > { %p7796_p5 = pneg %p7795_p1  ;;  %p7802_p4 = por %p7801_p2, %p7800_p8 }
  0x46   : > { %p7803_p6 = pnand %p7802_p4, %p7796_p5 }
  0x48   : > { %7806 = shalt.err (!%p7803_p6)
}
  0x49   : > { %s9015_s13 = smov 128   ;;  %231 = sbr.rel (%p8057_p12) target bundleno = 1748 (0x6d4), region = 36 }
  0x4a   : > { %7686 = dma.hbm_to_vmem [thread:$0]  (!%p8000_p0), %s8053_s10, 1536, %s8063_s24, %s207_s11, %s9015_s13, %s9015_s13, %s7897_s25  }
  0x4b   : > { %s8097_s14 = sand.u32 (!%p8057_p12), 1, %s7877_s16   ;;  %p9016_p8 = scmp.ne.s32.totalorder (!%p8057_p12), %s9009_s27, 0 }
  0x4c   : > { %s7671_s26 = smul.u32 (!%p8057_p12), 96, %s8097_s14  ;;  %s234_s9 = scalar_lea.sflag (!%p8057_p12), [#allocation5], %s8097_s14 }
  0x4e   : > { %s8101_s8 = scalar_lea.vmem (!%p8057_p12), [#allocation4], %s7671_s26 }
  0x50   : > { %7860 = dma.done.wait (%p9016_p8), %s234_s9, 1536  }
  0x51   : > { %7862 = vsyncadd (%p9016_p8), %s234_s9, 4294965760  ;;  %s243_s5 = scalar_lea.sflag [#allocation8], %s8097_s14  ;;  %s8108_s25 = scalar_lea.vmem [#allocation7], %s7671_s26 }
  0x52   : > { %7864 = dma.done.wait (%p9016_p8), %s243_s5, 1536  }
  0x53   : > { %7866 = vsyncadd (%p9016_p8), %s243_s5, 4294965760  ;;  %v7899_v0 = vmov 0.0|0.0   ;;  %vm7900_vm0 = vmmov 0   ;;  %v7901_v1 = vmov 0.0   ;;  %v282_v2 = vld [vmem:[%s8101_s8] sm:$0xff]  ;;  %v283_v3 = vld [vmem:[%s8101_s8 + $0x8] sm:$0xff] }
  0x54   : > { %7259 = vmatprep.subr.bf16.mxu0 %v7899_v0  ;;  %6587 = vmatprep.mubr.msk.f32.mxu0 %vm7900_vm0, %v7901_v1  ;;  %v284_v4 = vld [vmem:[%s8101_s8 + $0x10] sm:$0xff]  ;;  %v299_v5 = vand.u32 4294901760, %v282_v2  ;;  %v302_v6 = vand.u32 4294901760, %v283_v3  ;;  %v285_v7 = vld [vmem:[%s8101_s8 + $0x18] sm:$0xff]  ;;  %v286_v10 = vld [vmem:[%s8101_s8 + $0x20] sm:$0xff]  ;;  %vm294_vm1 = vcmask 785408  }
  0x55   : > { %7367 = vmatprep.subr.bf16.mxu1 %v7899_v0  ;;  %6733 = vmatprep.mubr.msk.f32.mxu1 %vm7900_vm0, %v7901_v1  ;;  %v305_v8 = vand.u32 4294901760, %v284_v4  ;;  %v308_v9 = vand.u32 4294901760, %v285_v7  ;;  %v287_v11 = vld [vmem:[%s8101_s8 + $0x28] sm:$0xff]  ;;  %v277_v13 = vld [vmem:[%s9002_s2] sm:$0xff]  ;;  %v311_v15 = vand.u32 4294901760, %v286_v10  ;;  %v289_v18 = vld [vmem:[%s8101_s8 + $0x38] sm:$0xff] }
  0x56   : > { %v8126_v12 = vpack.c.bf16 %v302_v6, %v299_v5  ;;  %v314_v16 = vand.u32 4294901760, %v287_v11  ;;  %v288_v17 = vld [vmem:[%s8101_s8 + $0x30] sm:$0xff]  ;;  %v296_v19 = vsel %vm294_vm1, %v277_v13, 0  ;;  %v8137_v20 = vsub.f32 %v282_v2, %v299_v5  ;;  %v290_v26 = vld [vmem:[%s8101_s8 + $0x40] sm:$0xff]  ;;  %v291_v27 = vld [vmem:[%s8101_s8 + $0x48] sm:$0xff]  ;;  %s274_s26 = scalar_lea.vmem [#allocation9], %s8097_s14 }
  0x57   : > { %v8132_v14 = vpack.c.bf16 %v308_v9, %v305_v8  ;;  %v8139_v21 = vsub.f32 %v283_v3, %v302_v6  ;;  %v317_v23 = vand.u32 4294901760, %v288_v17  ;;  %v320_v24 = vand.u32 4294901760, %v289_v18  ;;  %v292_v30 = vld [vmem:[%s8101_s8 + $0x50] sm:$0xff]  ;;  %v293_v31 = vld [vmem:[%s8101_s8 + $0x58] sm:$0xff]  ;;  %s6115_s9 = sshll.u32 %s274_s26, 4  ;;  %s6248_s8 = sshll.u32 %s7885_s18, 4  ;;  %s8953_s9 = int_to_ptr.vmem [resolvable:$true] %s6115_s9 }
  0x58   : > { %7261 = vmatpush3.bf16.msra.mxu0 %v8126_v12  ;;  %v8142_v22 = vpack.c.bf16 %v314_v16, %v311_v15  ;;  %v8144_v25 = vand.u32 4294901760, %v296_v19  ;;  %v8149_v28 = vsub.f32 %v284_v4, %v305_v8  ;;  %v8151_v29 = vsub.f32 %v285_v7, %v308_v9  ;;  %s8951_s12 = scalar_lea.hbm %s9004_s4, %s6248_s8  ;;  %s6103_s24 = scalar_lea.sflag [#allocation6], %s8097_s14 }
  0x59   : > { %7262 = vmatprep.subr.bf16.mxu0 %v7899_v0  ;;  %v388_v33 = vand.u32 4294901760, %v8137_v20  ;;  %v395_v34 = vand.u32 4294901760, %v8139_v21  ;;  %v8161_v35 = vpack.c.bf16 %v320_v24, %v317_v23  ;;  %v323_v36 = vand.u32 4294901760, %v290_v26  ;;  %s7807_s11 = scalar_lea.vmem %s8953_s9, 16  ;;  %p9021_p3 = scmp.ne.s32.totalorder %s9010_s28, 0 }
  0x5a   : > { %v8156_v32 = vsub.f32 %v296_v19, %v8144_v25  ;;  %v326_v37 = vand.u32 4294901760, %v291_v27  ;;  %v8163_v38 = vsub.f32 %v286_v10, %v311_v15  ;;  %v8165_v39 = vsub.f32 %v287_v11, %v314_v16  ;;  %p7808_p0 = scmp.ne.s32.totalorder %s8953_s9, %s7807_s11  ;;  %s7903_s18 = smov [#allocation9]  }
  0x5b   : > { %v329_v40 = vand.u32 4294901760, %v292_v30  ;;  %v332_v41 = vand.u32 4294901760, %v293_v31  ;;  %v8168_v42 = vsub.f32 %v288_v17, %v317_v23  ;;  %v8170_v43 = vsub.f32 %v289_v18, %v320_v24  ;;  %s7811_s6 = sshll.u32 %s7903_s18, 4  ;;  %s7812_s6 = int_to_ptr.vmem [resolvable:$false] %s7811_s6 }
  0x5c   : > { %7264 = vmatpush3.bf16.msra.mxu0 %v8132_v14  ;;  %v402_v44 = vand.u32 4294901760, %v8149_v28  ;;  %v409_v45 = vand.u32 4294901760, %v8151_v29  ;;  %v8174_v46 = vsub.f32 %v290_v26, %v323_v36  ;;  %v8177_v47 = vand.u32 4294901760, %v8156_v32  ;;  %p7809_p12 = pnand %p7808_p0, %p9021_p3  ;;  %s7813_s22 = scalar_lea.vmem %s7812_s6, 32 }
  0x5d   : > { %7265 = vmatprep.subr.bf16.mxu0 %v7899_v0  ;;  %v389_v48 = vsub.f32 %v8137_v20, %v388_v33  ;;  %v396_v49 = vsub.f32 %v8139_v21, %v395_v34  ;;  %v8182_v50 = vpack.c.bf16 %v326_v37, %v323_v36  ;;  %v8184_v51 = vsub.f32 %v291_v27, %v326_v37  ;;  %p7814_p7 = scmp.lt.s32.totalorder %s8953_s9, %s7812_s6  ;;  %p7815_p10 = scmp.lt.s32.totalorder %s7813_s22, %s7807_s11 }
  0x5e   : > { %v8186_v52 = vsub.f32 %v292_v30, %v329_v40  ;;  %v8188_v53 = vsub.f32 %v293_v31, %v332_v41  ;;  %v8191_v54 = vpack.c.bf16 %v332_v41, %v329_v40  ;;  %v416_v55 = vand.u32 4294901760, %v8163_v38  ;;  %p7810_p13 = pneg %p7809_p12 }
  0x5f   : > { %v403_v56 = vsub.f32 %v8149_v28, %v402_v44  ;;  %v410_v57 = vsub.f32 %v8151_v29, %v409_v45  ;;  %v423_v58 = vand.u32 4294901760, %v8165_v39  ;;  %v430_v59 = vand.u32 4294901760, %v8168_v42  ;;  %p7816_p9 = por %p7815_p10, %p7814_p7 }
  0x60   : > { %7267 = vmatpush3.bf16.msra.mxu0 %v8142_v22  ;;  %v378_v60 = vsub.f32 %v8156_v32, %v8177_v47  ;;  %v390_v61 = vand.u32 4294901760, %v389_v48  ;;  %v397_v62 = vand.u32 4294901760, %v396_v49  ;;  %v437_v63 = vand.u32 4294901760, %v8170_v43 }
  0x61   : > { %7268 = vmatprep.subr.bf16.mxu0 %v7899_v0  ;;  %v444_v2 = vand.u32 4294901760, %v8174_v46  ;;  %v451_v3 = vand.u32 4294901760, %v8184_v51  ;;  %v458_v4 = vand.u32 4294901760, %v8186_v52  ;;  %v465_v5 = vand.u32 4294901760, %v8188_v53  ;;  %p7817_p11 = pnand %p7816_p9, %p7810_p13 }
  0x62   : > { %v8207_v6 = vpack.c.bf16 %v395_v34, %v388_v33  ;;  %v8209_v7 = vpack.c.bf16 %v409_v45, %v402_v44  ;;  %v8211_v8 = vpack.c.bf16 %v423_v58, %v416_v55  ;;  %v8213_v9 = vpack.c.bf16 %v437_v63, %v430_v59 }
  0x63   : > { %v8215_v10 = vpack.c.bf16 %v451_v3, %v444_v2  ;;  %v8217_v11 = vpack.c.bf16 %v465_v5, %v458_v4  ;;  %v8219_v13 = vand.u32 4294901760, %v378_v60  ;;  %v417_v15 = vsub.f32 %v8163_v38, %v416_v55 }
  0x64   : > { %7270 = vmatpush3.bf16.msra.mxu0 %v8161_v35  ;;  %v7278_v16 = vpack.c.bf16 %v397_v62, %v390_v61  ;;  %v404_v17 = vand.u32 4294901760, %v403_v56  ;;  %v411_v18 = vand.u32 4294901760, %v410_v57  ;;  %v424_v19 = vsub.f32 %v8165_v39, %v423_v58 }
  0x65   : > { %7271 = vmatprep.subr.bf16.mxu0 %v7899_v0  ;;  %v431_v23 = vsub.f32 %v8168_v42, %v430_v59  ;;  %v418_v26 = vand.u32 4294901760, %v417_v15  ;;  %v438_v30 = vsub.f32 %v8170_v43, %v437_v63  ;;  %v445_v36 = vsub.f32 %v8174_v46, %v444_v2 }
  0x66   : > { %v7281_v24 = vpack.c.bf16 %v411_v18, %v404_v17  ;;  %v425_v27 = vand.u32 4294901760, %v424_v19  ;;  %v452_v37 = vsub.f32 %v8184_v51, %v451_v3  ;;  %v459_v40 = vsub.f32 %v8186_v52, %v458_v4 }
  0x67   : > { %v432_v31 = vand.u32 4294901760, %v431_v23  ;;  %v439_v34 = vand.u32 4294901760, %v438_v30  ;;  %v446_v44 = vand.u32 4294901760, %v445_v36  ;;  %v466_v48 = vsub.f32 %v8188_v53, %v465_v5  ;;  %v1379_v36 = vld [vmem:[%s8108_s25 + $0x8] sm:$0xff] }
  0x68   : > { %7273 = vmatpush3.bf16.msra.mxu0 %v8182_v50  ;;  %v7284_v33 = vpack.c.bf16 %v425_v27, %v418_v26  ;;  %v453_v45 = vand.u32 4294901760, %v452_v37  ;;  %v460_v55 = vand.u32 4294901760, %v459_v40  ;;  %v7296_v58 = vpack.c.bf16 %v8139_v21, %v8137_v20 }
  0x69   : > { %7274 = vmatprep.subr.bf16.mxu0 %v7899_v0  ;;  %v7287_v41 = vpack.c.bf16 %v439_v34, %v432_v31  ;;  %v467_v56 = vand.u32 4294901760, %v466_v48  ;;  %v7299_v59 = vpack.c.bf16 %v8151_v29, %v8149_v28  ;;  %v7302_v60 = vpack.c.bf16 %v8165_v39, %v8163_v38  ;;  %v1378_v34 = vld [vmem:[%s8108_s25] sm:$0xff] }
  0x6a   : > { %v7290_v49 = vpack.c.bf16 %v453_v45, %v446_v44  ;;  %v7305_v20 = vpack.c.bf16 %v8170_v43, %v8168_v42  ;;  %v7308_v21 = vpack.c.bf16 %v8184_v51, %v8174_v46  ;;  %v7311_v28 = vpack.c.bf16 %v8188_v53, %v8186_v52  ;;  %v280_v42 = vld [vmem:[%s9003_s3 + $0x10] sm:$0xff]  ;;  %v281_v43 = vld [vmem:[%s9003_s3 + $0x18] sm:$0xff]  ;;  %v1381_v44 = vld [vmem:[%s8108_s25 + $0x18] sm:$0xff] }
  0x6b   : > { %v7293_v57 = vpack.c.bf16 %v467_v56, %v460_v55  ;;  %v898_v46 = vand.u32 4294901760, %v280_v42  ;;  %vm887_vm2 = vcmask 261120   ;;  %v1391_v37 = vand.u32 4294901760, %v1378_v34  ;;  %v1382_v55 = vld [vmem:[%s8108_s25 + $0x20] sm:$0xff]  ;;  %v1383_v56 = vld [vmem:[%s8108_s25 + $0x28] sm:$0xff] }
  0x6c   : > { %7276 = vmatpush3.bf16.msra.mxu0 %v8191_v54  ;;  %v1394_v40 = vand.u32 4294901760, %v1379_v36  ;;  %vm1376_vm3 = vcmask 64512  }
  0x6d   : > { %7277 = vmatprep.subr.bf16.mxu0 %v7899_v0  ;;  %v986_v62 = vsub.f32 %v280_v42, %v898_v46 }
  0x6e   : > { %v8379_v45 = vpack.c.bf16 %v1394_v40, %v1391_v37 }
  0x6f   : > { %6588 = vmatmul.mubr.f32.vlgmr.msra.gmra.mrb[0].mxu0 %v8219_v13  ;;  %v987_v4 = vand.u32 4294901760, %v986_v62 }
  0x70   : > { %7279 = vmatpush3.bf16.msra.mxu0 %v7278_v16  ;;  %6614 = vmatprep.mubr.msk.f32.mxu0 %vm7900_vm0, %v7901_v1 }
  0x71   : > { %7280 = vmatprep.subr.bf16.mxu0 %v7899_v0 }
  0x74   : > { %7282 = vmatpush3.bf16.msra.mxu0 %v7281_v24 }
  0x75   : > { %7283 = vmatprep.subr.bf16.mxu0 %v7899_v0 }
  0x78   : > { %7285 = vmatpush3.bf16.msra.mxu0 %v7284_v33 }
  0x79   : > { %7286 = vmatprep.subr.bf16.mxu0 %v7899_v0 }
  0x7c   : > { %7288 = vmatpush3.bf16.msra.mxu0 %v7287_v41  ;;  %v1380_v41 = vld [vmem:[%s8108_s25 + $0x10] sm:$0xff] }
  0x7d   : > { %7289 = vmatprep.subr.bf16.mxu0 %v7899_v0  ;;  %v1397_v48 = vand.u32 4294901760, %v1380_v41 }
  0x80   : > { %7291 = vmatpush3.bf16.msra.mxu0 %v7290_v49  ;;  %v1400_v49 = vand.u32 4294901760, %v1381_v44 }
  0x81   : > { %7292 = vmatprep.subr.bf16.mxu0 %v7899_v0 }
  0x84   : > { %7294 = vmatpush3.bf16.msra.mxu0 %v7293_v57  ;;  %v8385_v57 = vpack.c.bf16 %v1400_v49, %v1397_v48 }
  0x85   : > { %7295 = vmatprep.subr.bf16.mxu0 %v7899_v0 }
  0x87   : > { %6615 = vmatmul.mubr.f32.vlgmr.msra.gmra.mrb[0].mxu0 %v8144_v25 }
  0x88   : > { %7297 = vmatpush3.bf16.msra.mxu0 %v7296_v58  ;;  %6641 = vmatprep.mubr.msk.f32.mxu0 %vm7900_vm0, %v7901_v1  ;;  %v1403_v58 = vand.u32 4294901760, %v1382_v55 }
  0x89   : > { %7298 = vmatprep.subr.bf16.mxu0 %v7899_v0 }
  0x8c   : > { %7300 = vmatpush3.bf16.msra.mxu0 %v7299_v59  ;;  %v1406_v59 = vand.u32 4294901760, %v1383_v56 }
  0x8d   : > { %7301 = vmatprep.subr.bf16.mxu0 %v7899_v0 }
  0x90   : > { %7303 = vmatpush3.bf16.msra.mxu0 %v7302_v60  ;;  %v1384_v60 = vld [vmem:[%s8108_s25 + $0x30] sm:$0xff] }
  0x91   : > { %7304 = vmatprep.subr.bf16.mxu0 %v7899_v0 }
  0x94   : > { %7306 = vmatpush3.bf16.msra.mxu0 %v7305_v20  ;;  %v1385_v20 = vld [vmem:[%s8108_s25 + $0x38] sm:$0xff] }
  0x95   : > { %7307 = vmatprep.subr.bf16.mxu0 %v7899_v0 }
  0x98   : > { %7309 = vmatpush3.bf16.msra.mxu0 %v7308_v21  ;;  %v8392_v21 = vsub.f32 %v1378_v34, %v1391_v37 }
  0x99   : > { %7310 = vmatprep.subr.bf16.mxu0 %v7899_v0 }
  0x9c   : > { %7312 = vmatpush3.bf16.msra.mxu0 %v7311_v28  ;;  %v8394_v28 = vsub.f32 %v1379_v36, %v1394_v40 }
  0x9d   : > { %7313 = vmatprep.subr.bf16.mxu0 %v7899_v0 }
  0x9f   : > { %6642 = vmatmul.mubr.f32.vlgmr.msra.gmra.mrb[0].mxu0 %v8156_v32 }
  0xa0   : > { %7315 = vmatpush3.bf16.msra.mxu0 %v8126_v12  ;;  %6668 = vmatprep.mubr.msk.f32.mxu0 %vm7900_vm0, %v7901_v1 }
  0xa1   : > { %7316 = vmatprep.subr.bf16.mxu0 %v7899_v0 }
  0xa4   : > { %7318 = vmatpush3.bf16.msra.mxu0 %v8132_v14 }
  0xa5   : > { %7319 = vmatprep.subr.bf16.mxu0 %v7899_v0 }
  0xa8   : > { %7321 = vmatpush3.bf16.msra.mxu0 %v8142_v22 }
  0xa9   : > { %7322 = vmatprep.subr.bf16.mxu0 %v7899_v0 }
  0xac   : > { %7324 = vmatpush3.bf16.msra.mxu0 %v8161_v35 }
  0xad   : > { %7325 = vmatprep.subr.bf16.mxu0 %v7899_v0 }
  0xb0   : > { %7327 = vmatpush3.bf16.msra.mxu0 %v8182_v50 }
  0xb1   : > { %7328 = vmatprep.subr.bf16.mxu0 %v7899_v0 }
  0xb4   : > { %7330 = vmatpush3.bf16.msra.mxu0 %v8191_v54 }
  0xb5   : > { %7331 = vmatprep.subr.bf16.mxu0 %v7899_v0 }
  0xb7   : > { %6669 = vmatmul.mubr.f32.vlgmr.msra.gmra.mrb[0].mxu0 %v8177_v47 }
  0xb8   : > { %7333 = vmatpush3.bf16.msra.mxu0 %v8207_v6  ;;  %6695 = vmatprep.mubr.msk.f32.mxu0 %vm7900_vm0, %v7901_v1 }
  0xb9   : > { %7334 = vmatprep.subr.bf16.mxu0 %v7899_v0 }
  0xbc   : > { %7336 = vmatpush3.bf16.msra.mxu0 %v8209_v7  ;;  %v988_v7 = vsub.f32 %v986_v62, %v987_v4 }
  0xbd   : > { %7337 = vmatprep.subr.bf16.mxu0 %v7899_v0 }
  0xc0   : > { %7339 = vmatpush3.bf16.msra.mxu0 %v8211_v8 }
  0xc1   : > { %7340 = vmatprep.subr.bf16.mxu0 %v7899_v0 }
  0xc4   : > { %7342 = vmatpush3.bf16.msra.mxu0 %v8213_v9  ;;  %v989_v9 = vand.u32 4294901760, %v988_v7 }
  0xc5   : > { %7343 = vmatprep.subr.bf16.mxu0 %v7899_v0 }
  0xc8   : > { %7345 = vmatpush3.bf16.msra.mxu0 %v8215_v10 }
  0xc9   : > { %7346 = vmatprep.subr.bf16.mxu0 %v7899_v0 }
  0xcc   : > { %7348 = vmatpush3.bf16.msra.mxu0 %v8217_v11 }
  0xcd   : > { %7349 = vmatprep.subr.bf16.mxu0 %v7899_v0 }
  0xcf   : > { %6696 = vmatmul.mubr.f32.vlgmr.msra.gmra.mrb[0].mxu0 %v8144_v25 }
  0xd0   : > { %7351 = vmatpush3.bf16.msra.mxu0 %v8126_v12  ;;  %6722 = vmatprep.mubr.msk.f32.mxu0 %vm7900_vm0, %v7901_v1  ;;  %v278_v12 = vld [vmem:[%s9003_s3] sm:$0xff] }
  0xd1   : > { %7352 = vmatprep.subr.bf16.mxu0 %v7899_v0 }
  0xd4   : > { %7354 = vmatpush3.bf16.msra.mxu0 %v8132_v14  ;;  %v279_v14 = vld [vmem:[%s9003_s3 + $0x8] sm:$0xff] }
  0xd5   : > { %7355 = vmatprep.subr.bf16.mxu0 %v7899_v0  ;;  %v895_v29 = vand.u32 4294901760, %v279_v14 }
  0xd7   : > { %v979_v39 = vsub.f32 %v279_v14, %v895_v29  ;;  %v1409_v14 = vand.u32 4294901760, %v1384_v60 }
  0xd8   : > { %7357 = vmatpush3.bf16.msra.mxu0 %v8142_v22  ;;  %v892_v22 = vand.u32 4294901760, %v278_v12 }
  0xd9   : > { %7358 = vmatprep.subr.bf16.mxu0 %v7899_v0  ;;  %v980_v52 = vand.u32 4294901760, %v979_v39 }
  0xda   : > { %v972_v38 = vsub.f32 %v278_v12, %v892_v22  ;;  %v8397_v12 = vpack.c.bf16 %v1406_v59, %v1403_v58 }
  0xdb   : > { %v981_v61 = vsub.f32 %v979_v39, %v980_v52 }
  0xdc   : > { %7360 = vmatpush3.bf16.msra.mxu0 %v8161_v35  ;;  %v8315_v35 = vpack.c.bf16 %v895_v29, %v892_v22  ;;  %v973_v51 = vand.u32 4294901760, %v972_v38  ;;  %v8337_v15 = vpack.c.bf16 %v979_v39, %v972_v38  ;;  %v1412_v22 = vand.u32 4294901760, %v1385_v20  ;;  %v1386_v29 = vld [vmem:[%s8108_s25 + $0x40] sm:$0xff] }
  0xdd   : > { %7361 = vmatprep.subr.bf16.mxu0 %v7899_v0  ;;  %v982_v3 = vand.u32 4294901760, %v981_v61  ;;  %v8402_v39 = vsub.f32 %v1380_v41, %v1397_v48  ;;  %v1415_v42 = vand.u32 4294901760, %v1386_v29  ;;  %v1487_v61 = vand.u32 4294901760, %v8394_v28 }
  0xde   : > { %7369 = vmatpush3.bf16.msra.mxu1 %v8315_v35  ;;  %v8341_v17 = vpack.c.bf16 %v980_v52, %v973_v51  ;;  %v1389_v52 = vld [vmem:[%s8108_s25 + $0x58] sm:$0xff] }
  0xdf   : > { %7370 = vmatprep.subr.bf16.mxu1 %v7899_v0  ;;  %v1488_v7 = vsub.f32 %v8394_v28, %v1487_v61  ;;  %v8446_v34 = vsub.f32 %v1386_v29, %v1415_v42 }
  0xe0   : > { %7363 = vmatpush3.bf16.msra.mxu0 %v8182_v50  ;;  %v901_v50 = vand.u32 4294901760, %v281_v43 }
  0xe1   : > { %7364 = vmatprep.subr.bf16.mxu0 %v7899_v0  ;;  %v1536_v29 = vand.u32 4294901760, %v8446_v34 }
  0xe2   : > { %v8327_v53 = vpack.c.bf16 %v901_v50, %v898_v46  ;;  %v993_v63 = vsub.f32 %v281_v43, %v901_v50  ;;  %v8404_v46 = vsub.f32 %v1381_v44, %v1400_v49  ;;  %v8407_v50 = vpack.c.bf16 %v1412_v22, %v1409_v14 }
  0xe4   : > { %7366 = vmatpush3.bf16.msra.mxu0 %v8191_v54  ;;  %v974_v54 = vsub.f32 %v972_v38, %v973_v51  ;;  %7372 = vmatpush3.bf16.msra.mxu1 %v8327_v53  ;;  %v994_v5 = vand.u32 4294901760, %v993_v63  ;;  %v8339_v16 = vpack.c.bf16 %v993_v63, %v986_v62  ;;  %v1387_v38 = vld [vmem:[%s8108_s25 + $0x48] sm:$0xff]  ;;  %v1388_v51 = vld [vmem:[%s8108_s25 + $0x50] sm:$0xff]  ;;  %v8414_v62 = vsub.f32 %v1382_v55, %v1403_v58 }
  0xe5   : > { %7511 = vmatprep.subr.bf16.mxu0 %v7899_v0  ;;  %7373 = vmatprep.subr.bf16.mxu1 %v7899_v0  ;;  %v1418_v43 = vand.u32 4294901760, %v1387_v38 }
  0xe6   : > { %v975_v2 = vand.u32 4294901760, %v974_v54  ;;  %v995_v8 = vsub.f32 %v993_v63, %v994_v5  ;;  %v8343_v18 = vpack.c.bf16 %v994_v5, %v987_v4  ;;  %v1480_v54 = vand.u32 4294901760, %v8392_v21 }
  0xe7   : > { %6723 = vmatmul.mubr.f32.vlgmr.msra.gmra.mrb[0].mxu0 %v8144_v25  ;;  %v8416_v63 = vsub.f32 %v1383_v56, %v1406_v59  ;;  %v1424_v4 = vand.u32 4294901760, %v1389_v52  ;;  %v8456_v44 = vsub.f32 %v1387_v38, %v1418_v43 }
  0xe8   : > { %6961 = vmatprep.mubr.msk.f32.mxu0 %vm7900_vm0, %v7901_v1  ;;  %7513 = vmatpush3.bf16.msra.mxu0 %v8315_v35  ;;  %v8333_v6 = vpack.c.bf16 %v982_v3, %v975_v2  ;;  %v996_v10 = vand.u32 4294901760, %v995_v8  ;;  %v8418_v2 = vpack.c.bf16 %v1418_v43, %v1415_v42  ;;  %v1421_v3 = vand.u32 4294901760, %v1388_v51 }
  0xe9   : > { %7514 = vmatprep.subr.bf16.mxu0 %v7899_v0  ;;  %v1481_v5 = vsub.f32 %v8392_v21, %v1480_v54  ;;  %v1494_v8 = vand.u32 4294901760, %v8402_v39  ;;  %v1543_v38 = vand.u32 4294901760, %v8456_v44 }
  0xea   : > { %v8335_v11 = vpack.c.bf16 %v996_v10, %v989_v9  ;;  %v1501_v9 = vand.u32 4294901760, %v8404_v46  ;;  %v8430_v10 = vsub.f32 %v1384_v60, %v1409_v14  ;;  %v8460_v56 = vsub.f32 %v1388_v51, %v1421_v3 }
  0xeb   : > { %v8469_v14 = vsub.f32 %v1389_v52, %v1424_v4  ;;  %v1537_v51 = vsub.f32 %v8446_v34, %v1536_v29  ;;  %v1544_v52 = vsub.f32 %v8456_v44, %v1543_v38 }
  0xec   : > { %7516 = vmatpush3.bf16.msra.mxu0 %v8327_v53  ;;  %v1522_v40 = vand.u32 4294901760, %v8430_v10 }
  0xed   : > { %7517 = vmatprep.subr.bf16.mxu0 %v7899_v0 }
  0xee   : > { %v1523_v60 = vsub.f32 %v8430_v10, %v1522_v40 }
  0xf0   : > { %v1524_v42 = vand.u32 4294901760, %v1523_v60  ;;  %v7452_v60 = vpack.c.bf16 %v8456_v44, %v8446_v34 }
 0x1ba   : > { %v883_v19 = vpop.f32.mrb[0].mxu0 }
 0x1bb   : > { %v889_v23 = vsel %vm887_vm2, %v883_v19, 0  ;;  %v6724_v24 = vpop.f32.mrb[1].mxu0  ;;  %v8432_v19 = vsub.f32 %v1385_v20, %v1412_v22 }
 0x1bc   : > { %v960_v26 = vand.u32 4294901760, %v889_v23  ;;  %v1508_v24 = vand.u32 4294901760, %v8414_v62 }
 0x1bd   : > { %v1529_v41 = vand.u32 4294901760, %v8432_v19 }
 0x1be   : > { %v961_v27 = vsub.f32 %v889_v23, %v960_v26  ;;  %v8434_v23 = vpack.c.bf16 %v1424_v4, %v1421_v3  ;;  %v1509_v36 = vsub.f32 %v8414_v62, %v1508_v24  ;;  %v1550_v3 = vand.u32 4294901760, %v8460_v56 }
 0x1bf   : > { %v1530_v20 = vsub.f32 %v8432_v19, %v1529_v41  ;;  %v1557_v4 = vand.u32 4294901760, %v8469_v14 }
 0x1c0   : > { %v962_v30 = vand.u32 4294901760, %v961_v27  ;;  %v1510_v58 = vand.u32 4294901760, %v1509_v36 }
 0x1c1   : > { %v1531_v43 = vand.u32 4294901760, %v1530_v20  ;;  %v7455_v20 = vpack.c.bf16 %v8469_v14, %v8460_v56 }
 0x1c2   : > { %v963_v31 = vsub.f32 %v961_v27, %v962_v30 }
 0x1c4   : > { %v964_v33 = vand.u32 4294901760, %v963_v31  ;;  %v1495_v31 = vsub.f32 %v8402_v39, %v1494_v8 }
 0x1c6   : > { %6734 = vmatmul.mubr.f32.vlgmr.msra.gmra.mrb[0].mxu1 %v964_v33  ;;  %v1502_v33 = vsub.f32 %v8404_v46, %v1501_v9  ;;  %v1496_v49 = vand.u32 4294901760, %v1495_v31  ;;  %v1558_v31 = vsub.f32 %v8469_v14, %v1557_v4 }
 0x1c7   : > { %7375 = vmatpush3.bf16.msra.mxu1 %v8333_v6  ;;  %6744 = vmatprep.mubr.msk.f32.mxu1 %vm7900_vm0, %v7901_v1 }
 0x1c8   : > { %7376 = vmatprep.subr.bf16.mxu1 %v7899_v0  ;;  %v1503_v55 = vand.u32 4294901760, %v1502_v33 }
 0x1ca   : > { %v7425_v22 = vpack.c.bf16 %v1503_v55, %v1496_v49  ;;  %v7440_v49 = vpack.c.bf16 %v8394_v28, %v8392_v21  ;;  %v7443_v55 = vpack.c.bf16 %v8404_v46, %v8402_v39  ;;  %v7488_v28 = vpack.c.bf16 %v1543_v38, %v1536_v29 }
 0x1cb   : > { %7378 = vmatpush3.bf16.msra.mxu1 %v8335_v11  ;;  %v7491_v39 = vpack.c.bf16 %v1557_v4, %v1550_v3 }
 0x1cc   : > { %7379 = vmatprep.subr.bf16.mxu1 %v7899_v0 }
 0x1ce   : > { %6745 = vmatmul.mubr.f32.vlgmr.msra.gmra.mrb[0].mxu1 %v960_v26 }
 0x1cf   : > { %7381 = vmatpush3.bf16.msra.mxu1 %v8337_v15  ;;  %6755 = vmatprep.mubr.msk.f32.mxu1 %vm7900_vm0, %v7901_v1 }
 0x1d0   : > { %7382 = vmatprep.subr.bf16.mxu1 %v7899_v0 }
 0x1d3   : > { %7384 = vmatpush3.bf16.msra.mxu1 %v8339_v16 }
 0x1d4   : > { %7385 = vmatprep.subr.bf16.mxu1 %v7899_v0 }
 0x1d6   : > { %6756 = vmatmul.mubr.f32.vlgmr.msra.gmra.mrb[0].mxu1 %v961_v27  ;;  %v1482_v27 = vand.u32 4294901760, %v1481_v5  ;;  %v7431_v5 = vpack.c.bf16 %v1531_v43, %v1524_v42 }
 0x1d7   : > { %7387 = vmatpush3.bf16.msra.mxu1 %v8315_v35  ;;  %6766 = vmatprep.mubr.msk.f32.mxu1 %vm7900_vm0, %v7901_v1 }
 0x1d8   : > { %7388 = vmatprep.subr.bf16.mxu1 %v7899_v0 }
 0x1db   : > { %7390 = vmatpush3.bf16.msra.mxu1 %v8327_v53 }
 0x1dc   : > { %7391 = vmatprep.subr.bf16.mxu1 %v7899_v0 }
 0x1de   : > { %6767 = vmatmul.mubr.f32.vlgmr.msra.gmra.mrb[0].mxu1 %v962_v30  ;;  %v1489_v30 = vand.u32 4294901760, %v1488_v7  ;;  %v1538_v7 = vand.u32 4294901760, %v1537_v51 }
 0x1df   : > { %7393 = vmatpush3.bf16.msra.mxu1 %v8341_v17  ;;  %6777 = vmatprep.mubr.msk.f32.mxu1 %vm7900_vm0, %v7901_v1 }
 0x1e0   : > { %7394 = vmatprep.subr.bf16.mxu1 %v7899_v0  ;;  %v7422_v48 = vpack.c.bf16 %v1489_v30, %v1482_v27  ;;  %v1545_v27 = vand.u32 4294901760, %v1544_v52  ;;  %v1551_v30 = vsub.f32 %v8460_v56, %v1550_v3 }
 0x1e2   : > { %v7434_v33 = vpack.c.bf16 %v1545_v27, %v1538_v7  ;;  %v1552_v36 = vand.u32 4294901760, %v1551_v30 }
 0x1e3   : > { %7396 = vmatpush3.bf16.msra.mxu1 %v8343_v18 }
 0x1e4   : > { %7397 = vmatprep.subr.bf16.mxu1 %v7899_v0 }
 0x1e6   : > { %6778 = vmatmul.mubr.f32.vlgmr.msra.gmra.mrb[0].mxu1 %v960_v26 }
 0x1e7   : > { %7399 = vmatpush3.bf16.msra.mxu1 %v8315_v35  ;;  %6788 = vmatprep.mubr.msk.f32.mxu1 %vm7900_vm0, %v7901_v1 }
 0x1e8   : > { %7400 = vmatprep.subr.bf16.mxu1 %v7899_v0 }
 0x1eb   : > { %7402 = vmatpush3.bf16.msra.mxu1 %v8327_v53 }
 0x1ec   : > { %7403 = vmatprep.subr.bf16.mxu1 %v7899_v0 }
 0x1ee   : > { %6789 = vmatmul.mubr.f32.vlgmr.msra.gmra.mrb[0].mxu1 %v960_v26  ;;  %v1515_v26 = vand.u32 4294901760, %v8416_v63 }
 0x1ef   : > { %7405 = vmatpush3.bf16.msra.mxu1 %v8379_v45  ;;  %6815 = vmatprep.mubr.msk.f32.mxu1 %vm7900_vm0, %v7901_v1 }
 0x1f0   : > { %7406 = vmatprep.subr.bf16.mxu1 %v7899_v0  ;;  %v1516_v37 = vsub.f32 %v8416_v63, %v1515_v26  ;;  %v7482_v21 = vpack.c.bf16 %v1515_v26, %v1508_v24 }
 0x1f2   : > { %v1517_v59 = vand.u32 4294901760, %v1516_v37  ;;  %v1559_v37 = vand.u32 4294901760, %v1558_v31 }
 0x1f3   : > { %7408 = vmatpush3.bf16.msra.mxu1 %v8385_v57 }
 0x1f4   : > { %7409 = vmatprep.subr.bf16.mxu1 %v7899_v0 }
 0x1f7   : > { %7411 = vmatpush3.bf16.msra.mxu1 %v8397_v12 }
 0x1f8   : > { %7412 = vmatprep.subr.bf16.mxu1 %v7899_v0 }
 0x1fb   : > { %7414 = vmatpush3.bf16.msra.mxu1 %v8407_v50 }
 0x1fc   : > { %7415 = vmatprep.subr.bf16.mxu1 %v7899_v0 }
 0x1ff   : > { %7417 = vmatpush3.bf16.msra.mxu1 %v8418_v2 }
 0x200   : > { %7418 = vmatprep.subr.bf16.mxu1 %v7899_v0 }
 0x203   : > { %7420 = vmatpush3.bf16.msra.mxu1 %v8434_v23 }
 0x204   : > { %7421 = vmatprep.subr.bf16.mxu1 %v7899_v0 }
 0x206   : > { %6816 = vmatmul.mubr.f32.vlgmr.msra.gmra.mrb[2].mxu1 %v8219_v13  ;;  %v7428_v13 = vpack.c.bf16 %v1517_v59, %v1510_v58  ;;  %v7446_v58 = vpack.c.bf16 %v8416_v63, %v8414_v62  ;;  %v7449_v59 = vpack.c.bf16 %v8432_v19, %v8430_v10  ;;  %v7902_v62 = vmov 1.0  }
 0x207   : > { %7423 = vmatpush3.bf16.msra.mxu1 %v7422_v48  ;;  %6842 = vmatprep.mubr.msk.f32.mxu1 %vm7900_vm0, %v7901_v1  ;;  %v7437_v48 = vpack.c.bf16 %v1559_v37, %v1552_v36 }
 0x208   : > { %7424 = vmatprep.subr.bf16.mxu1 %v7899_v0 }
 0x20b   : > { %7426 = vmatpush3.bf16.msra.mxu1 %v7425_v22  ;;  %v7479_v22 = vpack.c.bf16 %v1501_v9, %v1494_v8 }
 0x20c   : > { %7427 = vmatprep.subr.bf16.mxu1 %v7899_v0 }
 0x20f   : > { %7429 = vmatpush3.bf16.msra.mxu1 %v7428_v13 }
 0x210   : > { %7430 = vmatprep.subr.bf16.mxu1 %v7899_v0 }
 0x213   : > { %7432 = vmatpush3.bf16.msra.mxu1 %v7431_v5 }
 0x214   : > { %7433 = vmatprep.subr.bf16.mxu1 %v7899_v0 }
 0x217   : > { %7435 = vmatpush3.bf16.msra.mxu1 %v7434_v33 }
 0x218   : > { %7436 = vmatprep.subr.bf16.mxu1 %v7899_v0 }
 0x21b   : > { %7438 = vmatpush3.bf16.msra.mxu1 %v7437_v48 }
 0x21c   : > { %7439 = vmatprep.subr.bf16.mxu1 %v7899_v0 }
 0x21e   : > { %6843 = vmatmul.mubr.f32.vlgmr.msra.gmra.mrb[2].mxu1 %v8144_v25 }
 0x21f   : > { %7441 = vmatpush3.bf16.msra.mxu1 %v7440_v49  ;;  %6869 = vmatprep.mubr.msk.f32.mxu1 %vm7900_vm0, %v7901_v1 }
 0x220   : > { %7442 = vmatprep.subr.bf16.mxu1 %v7899_v0 }
 0x223   : > { %7444 = vmatpush3.bf16.msra.mxu1 %v7443_v55 }
 0x224   : > { %7445 = vmatprep.subr.bf16.mxu1 %v7899_v0 }
 0x227   : > { %7447 = vmatpush3.bf16.msra.mxu1 %v7446_v58 }
 0x228   : > { %7448 = vmatprep.subr.bf16.mxu1 %v7899_v0 }
 0x22b   : > { %7450 = vmatpush3.bf16.msra.mxu1 %v7449_v59 }
 0x22c   : > { %7451 = vmatprep.subr.bf16.mxu1 %v7899_v0 }
 0x22f   : > { %7453 = vmatpush3.bf16.msra.mxu1 %v7452_v60 }
 0x230   : > { %7454 = vmatprep.subr.bf16.mxu1 %v7899_v0 }
 0x233   : > { %7456 = vmatpush3.bf16.msra.mxu1 %v7455_v20 }
 0x234   : > { %7457 = vmatprep.subr.bf16.mxu1 %v7899_v0 }
 0x236   : > { %6870 = vmatmul.mubr.f32.vlgmr.msra.gmra.mrb[2].mxu1 %v8156_v32  ;;  %v7476_v32 = vpack.c.bf16 %v1487_v61, %v1480_v54 }
 0x237   : > { %7459 = vmatpush3.bf16.msra.mxu1 %v8379_v45  ;;  %6896 = vmatprep.mubr.msk.f32.mxu1 %vm7900_vm0, %v7901_v1 }
 0x238   : > { %7460 = vmatprep.subr.bf16.mxu1 %v7899_v0 }
 0x23b   : > { %7462 = vmatpush3.bf16.msra.mxu1 %v8385_v57 }
 0x23c   : > { %7463 = vmatprep.subr.bf16.mxu1 %v7899_v0 }
 0x23f   : > { %7465 = vmatpush3.bf16.msra.mxu1 %v8397_v12 }
 0x240   : > { %7466 = vmatprep.subr.bf16.mxu1 %v7899_v0 }
 0x243   : > { %7468 = vmatpush3.bf16.msra.mxu1 %v8407_v50 }
 0x244   : > { %7469 = vmatprep.subr.bf16.mxu1 %v7899_v0 }
 0x247   : > { %7471 = vmatpush3.bf16.msra.mxu1 %v8418_v2 }
 0x248   : > { %7472 = vmatprep.subr.bf16.mxu1 %v7899_v0 }
 0x24b   : > { %7474 = vmatpush3.bf16.msra.mxu1 %v8434_v23 }
 0x24c   : > { %7475 = vmatprep.subr.bf16.mxu1 %v7899_v0 }
 0x24e   : > { %6897 = vmatmul.mubr.f32.vlgmr.msra.gmra.mrb[2].mxu1 %v8177_v47  ;;  %v7485_v47 = vpack.c.bf16 %v1529_v41, %v1522_v40 }
 0x24f   : > { %7477 = vmatpush3.bf16.msra.mxu1 %v7476_v32  ;;  %6923 = vmatprep.mubr.msk.f32.mxu1 %vm7900_vm0, %v7901_v1 }
 0x250   : > { %7478 = vmatprep.subr.bf16.mxu1 %v7899_v0 }
 0x253   : > { %7480 = vmatpush3.bf16.msra.mxu1 %v7479_v22 }
 0x254   : > { %7481 = vmatprep.subr.bf16.mxu1 %v7899_v0 }
 0x257   : > { %7483 = vmatpush3.bf16.msra.mxu1 %v7482_v21 }
 0x258   : > { %7484 = vmatprep.subr.bf16.mxu1 %v7899_v0 }
 0x25b   : > { %7486 = vmatpush3.bf16.msra.mxu1 %v7485_v47 }
 0x25c   : > { %7487 = vmatprep.subr.bf16.mxu1 %v7899_v0 }
 0x25f   : > { %7489 = vmatpush3.bf16.msra.mxu1 %v7488_v28 }
 0x260   : > { %7490 = vmatprep.subr.bf16.mxu1 %v7899_v0 }
 0x263   : > { %7492 = vmatpush3.bf16.msra.mxu1 %v7491_v39 }
 0x264   : > { %7493 = vmatprep.subr.bf16.mxu1 %v7899_v0 }
 0x266   : > { %6924 = vmatmul.mubr.f32.vlgmr.msra.gmra.mrb[2].mxu1 %v8144_v25 }
 0x267   : > { %7495 = vmatpush3.bf16.msra.mxu1 %v8379_v45  ;;  %6950 = vmatprep.mubr.msk.f32.mxu1 %vm7900_vm0, %v7901_v1 }
 0x268   : > { %7496 = vmatprep.subr.bf16.mxu1 %v7899_v0 }
 0x26b   : > { %7498 = vmatpush3.bf16.msra.mxu1 %v8385_v57 }
 0x26c   : > { %7499 = vmatprep.subr.bf16.mxu1 %v7899_v0 }
 0x26f   : > { %7501 = vmatpush3.bf16.msra.mxu1 %v8397_v12  ;;  %v2468_v12 = vlaneseq }
 0x270   : > { %7502 = vmatprep.subr.bf16.mxu1 %v7899_v0 }
 0x271   : > { %v2469_v46 = vshrl.u32 %v2468_v12, 7 }
 0x273   : > { %7504 = vmatpush3.bf16.msra.mxu1 %v8407_v50  ;;  %v2471_v50 = vand.u32 127, %v2468_v12  ;;  %v2472_v54 = vadd.s32 1, %v2469_v46 }
 0x274   : > { %7505 = vmatprep.subr.bf16.mxu1 %v7899_v0 }
 0x275   : > { %vm8583_vm4 = vcmp.eq.s32.totalorder %v2471_v50, %v2472_v54 }
 0x277   : > { %7507 = vmatpush3.bf16.msra.mxu1 %v8418_v2 }
 0x278   : > { %7508 = vmatprep.subr.bf16.mxu1 %v7899_v0 }
 0x27b   : > { %7510 = vmatpush3.bf16.msra.mxu1 %v8434_v23 }
 0x27c   : > { %7049 = vmatprep.subr.mxu1 %v7901_v1 }
 0x27e   : > { %6951 = vmatmul.mubr.f32.vlgmr.msra.gmra.mrb[2].mxu1 %v8144_v25  ;;  %v2476_v25 = vadd.s32 4294967295, %v2469_v46 }
 0x27f   : > { %7051 = vmatprep.mubr.msk.f32.mxu1 %vm7900_vm0, %v7901_v1  ;;  %7050 = vmatpush3.msk.msra.mxu1 %vm8583_vm4, %v7902_v62 }
 0x280   : > { %7054 = vmatprep.subr.mxu1 %v7901_v1  ;;  %vm8591_vm5 = vcmp.eq.s32.totalorder %v2471_v50, %v2476_v25 }
 0x2c1   : > { %v1372_v45 = vpop.f32.mrb[0].mxu1 }
 0x2c2   : > { %1377 = vst.msk [vmem:[#allocation2] sm:$0xff] %vm1376_vm3, %v1372_v45  ;;  %v6790_v57 = vpop.f32.mrb[1].mxu1 }
 0x351   : > { %v1975_v2 = vpop.f32.mrb[2].mxu1 }
 0x352   : > { %v1980_v8 = vsel %vm887_vm2, %v1975_v2, 0  ;;  %v6952_v9 = vpop.f32.mrb[3].mxu1 }
 0x353   : > { %v2051_v10 = vand.u32 4294901760, %v1980_v8 }
 0x355   : > { %v2052_v19 = vsub.f32 %v1980_v8, %v2051_v10 }
 0x357   : > { %v2053_v23 = vand.u32 4294901760, %v2052_v19 }
 0x359   : > { %v2054_v24 = vsub.f32 %v2052_v19, %v2053_v23 }
 0x35b   : > { %v2055_v26 = vand.u32 4294901760, %v2054_v24 }
 0x35d   : > { %6962 = vmatmul.mubr.f32.vlgmr.msra.gmra.mrb[2].mxu0 %v2055_v26 }
 0x35e   : > { %7519 = vmatpush3.bf16.msra.mxu0 %v8333_v6  ;;  %6972 = vmatprep.mubr.msk.f32.mxu0 %vm7900_vm0, %v7901_v1  ;;  %v8612_v6 = vld [vmem:[#allocation2] sm:$0xff] }
 0x35f   : > { %7520 = vmatprep.subr.bf16.mxu0 %v7899_v0  ;;  %v8726_v42 = vand.u32 4294901760, %v8612_v6 }
 0x361   : > { %v4366_v51 = vsub.f32 %v8612_v6, %v8726_v42 }
 0x362   : > { %7522 = vmatpush3.bf16.msra.mxu0 %v8335_v11  ;;  %v2483_v11 = vsel %vm1376_vm3, %v8612_v6, 0 }
 0x363   : > { %7523 = vmatprep.subr.bf16.mxu0 %v7899_v0  ;;  %v4367_v3 = vand.u32 4294901760, %v4366_v51 }
 0x365   : > { %6973 = vmatmul.mubr.f32.vlgmr.msra.gmra.mrb[2].mxu0 %v2051_v10  ;;  %v4368_v5 = vsub.f32 %v4366_v51, %v4367_v3 }
 0x366   : > { %7525 = vmatpush3.bf16.msra.mxu0 %v8337_v15  ;;  %6983 = vmatprep.mubr.msk.f32.mxu0 %vm7900_vm0, %v7901_v1  ;;  %v8625_v15 = vsel %vm8583_vm4, 1.0, %v7901_v1 }
 0x367   : > { %7526 = vmatprep.subr.bf16.mxu0 %v7899_v0  ;;  %v8632_v34 = vsub.f32 %v8625_v15, %v8625_v15  ;;  %v4369_v27 = vand.u32 4294901760, %v4368_v5  ;;  %v5188_v30 = vsel %vm1376_vm3, %v8625_v15, 0 }
 0x368   : > { %v8771_v31 = vsub.f32 %v5188_v30, %v5188_v30 }
 0x369   : > { %v8640_v40 = vand.u32 4294901760, %v8632_v34 }
 0x36a   : > { %7528 = vmatpush3.bf16.msra.mxu0 %v8339_v16  ;;  %v8627_v16 = vand.u32 4294901760, %v2483_v11  ;;  %v8776_v33 = vand.u32 4294901760, %v8771_v31 }
 0x36b   : > { %7529 = vmatprep.subr.bf16.mxu0 %v7899_v0  ;;  %v2565_v41 = vsub.f32 %v8632_v34, %v8640_v40 }
 0x36c   : > { %v5259_v36 = vsub.f32 %v8771_v31, %v8776_v33 }
 0x36d   : > { %6984 = vmatmul.mubr.f32.vlgmr.msra.gmra.mrb[2].mxu0 %v2052_v19 }
 0x36e   : > { %7531 = vmatpush3.bf16.msra.mxu0 %v8315_v35  ;;  %6994 = vmatprep.mubr.msk.f32.mxu0 %vm7900_vm0, %v7901_v1  ;;  %v8786_v37 = vand.u32 4294901760, %v5259_v36 }
 0x36f   : > { %7532 = vmatprep.subr.bf16.mxu0 %v7899_v0 }
 0x372   : > { %7534 = vmatpush3.bf16.msra.mxu0 %v8327_v53 }
 0x373   : > { %7535 = vmatprep.subr.bf16.mxu0 %v7899_v0 }
 0x375   : > { %6995 = vmatmul.mubr.f32.vlgmr.msra.gmra.mrb[2].mxu0 %v2053_v23 }
 0x376   : > { %7537 = vmatpush3.bf16.msra.mxu0 %v8341_v17  ;;  %7005 = vmatprep.mubr.msk.f32.mxu0 %vm7900_vm0, %v7901_v1  ;;  %v2552_v17 = vsub.f32 %v2483_v11, %v8627_v16 }
 0x377   : > { %7538 = vmatprep.subr.bf16.mxu0 %v7899_v0 }
 0x37a   : > { %7540 = vmatpush3.bf16.msra.mxu0 %v8343_v18  ;;  %v2553_v18 = vand.u32 4294901760, %v2552_v17 }
 0x37b   : > { %7541 = vmatprep.subr.bf16.mxu0 %v7899_v0 }
 0x37c   : > { %v2554_v44 = vsub.f32 %v2552_v17, %v2553_v18 }
 0x37d   : > { %7006 = vmatmul.mubr.f32.vlgmr.msra.gmra.mrb[2].mxu0 %v2051_v10 }
 0x37e   : > { %7543 = vmatpush3.bf16.msra.mxu0 %v8315_v35  ;;  %7016 = vmatprep.mubr.msk.f32.mxu0 %vm7900_vm0, %v7901_v1  ;;  %v8652_v35 = vand.u32 4294901760, %v2565_v41 }
 0x37f   : > { %7544 = vmatprep.subr.bf16.mxu0 %v7899_v0  ;;  %v2555_v0 = vand.u32 4294901760, %v2554_v44 }
 0x382   : > { %7546 = vmatpush3.bf16.msra.mxu0 %v8327_v53  ;;  %v8677_v53 = vsel %vm8591_vm5, 1.0, %v7901_v1 }
 0x383   : > { %7019 = vmatprep.subr.mxu0 %v7901_v1  ;;  %v8681_v56 = vsub.f32 %v8677_v53, %v8677_v53  ;;  %v4286_v13 = vsel %vm1376_vm3, %v8677_v53, 0 }
 0x384   : > { %v8728_v43 = vsub.f32 %v4286_v13, %v4286_v13 }
 0x385   : > { %7017 = vmatmul.mubr.f32.vlgmr.msra.gmra.mrb[2].mxu0 %v2051_v10  ;;  %v8690_v14 = vand.u32 4294901760, %v8681_v56 }
 0x386   : > { %7020 = vmatpush3.msk.msra.mxu0 %vm8583_vm4, %v7902_v62  ;;  %7021 = vmatprep.mubr.msk.f32.mxu0 %vm7900_vm0, %v7901_v1  ;;  %v8734_v52 = vand.u32 4294901760, %v8728_v43 }
 0x387   : > { %7024 = vmatprep.subr.mxu0 %v7901_v1  ;;  %v3466_v29 = vsub.f32 %v8681_v56, %v8690_v14 }
 0x388   : > { %v4357_v4 = vsub.f32 %v8728_v43, %v8734_v52 }
 0x389   : > { %7022 = vmatmul.mubr.f32.vlgmr.msra.gmra.mrb[4].mxu0 %v2555_v0  ;;  %v8701_v38 = vand.u32 4294901760, %v3466_v29 }
 0x38a   : > { %7025 = vmatpush3.msra.mxu0 %v8652_v35  ;;  %7026 = vmatprep.mubr.msk.f32.mxu0 %vm7900_vm0, %v7901_v1  ;;  %v8745_v7 = vand.u32 4294901760, %v4357_v4 }
 0x38b   : > { %7029 = vmatprep.subr.mxu0 %v7901_v1 }
 0x391   : > { %7027 = vmatmul.mubr.f32.vlgmr.msra.gmra.mrb[4].mxu0 %v8627_v16 }
 0x392   : > { %7030 = vmatpush3.msra.mxu0 %v8632_v34  ;;  %7031 = vmatprep.mubr.msk.f32.mxu0 %vm7900_vm0, %v7901_v1 }
 0x393   : > { %7034 = vmatprep.subr.mxu0 %v7901_v1 }
 0x399   : > { %7032 = vmatmul.mubr.f32.vlgmr.msra.gmra.mrb[4].mxu0 %v2552_v17 }
 0x39a   : > { %7035 = vmatpush3.msk.msra.mxu0 %vm8583_vm4, %v7902_v62  ;;  %7036 = vmatprep.mubr.msk.f32.mxu0 %vm7900_vm0, %v7901_v1 }
 0x39b   : > { %7039 = vmatprep.subr.mxu0 %v7901_v1 }
 0x3a1   : > { %7037 = vmatmul.mubr.f32.vlgmr.msra.gmra.mrb[4].mxu0 %v2553_v18 }
 0x3a2   : > { %7040 = vmatpush3.msra.mxu0 %v8640_v40  ;;  %7041 = vmatprep.mubr.msk.f32.mxu0 %vm7900_vm0, %v7901_v1 }
 0x3a3   : > { %7044 = vmatprep.subr.mxu0 %v7901_v1 }
 0x3a9   : > { %7042 = vmatmul.mubr.f32.vlgmr.msra.gmra.mrb[4].mxu0 %v8627_v16 }
 0x3aa   : > { %7045 = vmatpush3.msk.msra.mxu0 %vm8583_vm4, %v7902_v62  ;;  %7046 = vmatprep.mubr.msk.f32.mxu0 %vm7900_vm0, %v7901_v1 }
 0x3ab   : > { %7079 = vmatprep.subr.mxu0 %v7901_v1 }
 0x3b1   : > { %7047 = vmatmul.mubr.f32.vlgmr.msra.gmra.mrb[4].mxu0 %v8627_v16 }
 0x3b2   : > { %7080 = vmatpush3.msk.msra.mxu0 %vm8591_vm5, %v7902_v62  ;;  %7081 = vmatprep.mubr.msk.f32.mxu0 %vm7900_vm0, %v7901_v1 }
 0x3b3   : > { %7084 = vmatprep.subr.mxu0 %v7901_v1 }
 0x3b5   : > { %7082 = vmatmul.mubr.f32.vlgmr.msra.gmra.mrb[6].mxu0 %v2555_v0 }
 0x3b6   : > { %7085 = vmatpush3.msra.mxu0 %v8701_v38  ;;  %7086 = vmatprep.mubr.msk.f32.mxu0 %vm7900_vm0, %v7901_v1 }
 0x3b7   : > { %7089 = vmatprep.subr.mxu0 %v7901_v1 }
 0x3bd   : > { %7087 = vmatmul.mubr.f32.vlgmr.msra.gmra.mrb[6].mxu0 %v8627_v16 }
 0x3be   : > { %7090 = vmatpush3.msra.mxu0 %v8681_v56  ;;  %7091 = vmatprep.mubr.msk.f32.mxu0 %vm7900_vm0, %v7901_v1 }
 0x3bf   : > { %7094 = vmatprep.subr.mxu0 %v7901_v1 }
 0x3c5   : > { %7092 = vmatmul.mubr.f32.vlgmr.msra.gmra.mrb[6].mxu0 %v2552_v17 }
 0x3c6   : > { %7095 = vmatpush3.msk.msra.mxu0 %vm8591_vm5, %v7902_v62  ;;  %7096 = vmatprep.mubr.msk.f32.mxu0 %vm7900_vm0, %v7901_v1 }
 0x3c7   : > { %7099 = vmatprep.subr.mxu0 %v7901_v1 }
 0x3cd   : > { %7097 = vmatmul.mubr.f32.vlgmr.msra.gmra.mrb[6].mxu0 %v2553_v18 }
 0x3ce   : > { %7100 = vmatpush3.msra.mxu0 %v8690_v14  ;;  %7101 = vmatprep.mubr.msk.f32.mxu0 %vm7900_vm0, %v7901_v1 }
 0x3cf   : > { %7104 = vmatprep.subr.mxu0 %v7901_v1 }
 0x3d5   : > { %7102 = vmatmul.mubr.f32.vlgmr.msra.gmra.mrb[6].mxu0 %v8627_v16 }
 0x3d6   : > { %7105 = vmatpush3.msk.msra.mxu0 %vm8591_vm5, %v7902_v62  ;;  %7106 = vmatprep.mubr.msk.f32.mxu0 %vm7900_vm0, %v7901_v1 }
 0x3d7   : > { %7139 = vmatprep.subr.mxu0 %v7901_v1 }
 0x3dd   : > { %7107 = vmatmul.mubr.f32.vlgmr.msra.gmra.mrb[6].mxu0 %v8627_v16 }
 0x3de   : > { %7140 = vmatpush3.msra.mxu0 %v8726_v42  ;;  %7141 = vmatprep.mubr.msk.f32.mxu0 %vm7900_vm0, %v7901_v1 }
 0x3df   : > { %7144 = vmatprep.subr.mxu0 %v7901_v1 }
 0x3e1   : > { %7142 = vmatmul.mubr.f32.vlgmr.msra.gmra.mrb[8].mxu0 %v8745_v7 }
 0x3e2   : > { %7145 = vmatpush3.msra.mxu0 %v4369_v27  ;;  %7146 = vmatprep.mubr.msk.f32.mxu0 %vm7900_vm0, %v7901_v1 }
 0x3e3   : > { %7149 = vmatprep.subr.mxu0 %v7901_v1 }
 0x3e9   : > { %7147 = vmatmul.mubr.msk.f32.vlgmr.msra.gmra.mrb[8].mxu0 %vm1376_vm3, %v8677_v53 }
 0x3ea   : > { %7150 = vmatpush3.msra.mxu0 %v4366_v51  ;;  %7151 = vmatprep.mubr.msk.f32.mxu0 %vm7900_vm0, %v7901_v1 }
 0x3eb   : > { %7154 = vmatprep.subr.mxu0 %v7901_v1 }
 0x3f1   : > { %7152 = vmatmul.mubr.f32.vlgmr.msra.gmra.mrb[8].mxu0 %v8728_v43 }
 0x3f2   : > { %7155 = vmatpush3.msra.mxu0 %v8726_v42  ;;  %7156 = vmatprep.mubr.msk.f32.mxu0 %vm7900_vm0, %v7901_v1 }
 0x3f3   : > { %7159 = vmatprep.subr.mxu0 %v7901_v1 }
 0x3f9   : > { %7157 = vmatmul.mubr.f32.vlgmr.msra.gmra.mrb[8].mxu0 %v8734_v52 }
 0x3fa   : > { %7160 = vmatpush3.msra.mxu0 %v4367_v3  ;;  %7161 = vmatprep.mubr.msk.f32.mxu0 %vm7900_vm0, %v7901_v1 }
 0x3fb   : > { %7164 = vmatprep.subr.mxu0 %v7901_v1 }
 0x401   : > { %7162 = vmatmul.mubr.msk.f32.vlgmr.msra.gmra.mrb[8].mxu0 %vm1376_vm3, %v8677_v53 }
 0x402   : > { %7165 = vmatpush3.msra.mxu0 %v8726_v42  ;;  %7166 = vmatprep.mubr.msk.f32.mxu0 %vm7900_vm0, %v7901_v1 }
 0x403   : > { %7199 = vmatprep.subr.mxu0 %v7901_v1 }
 0x409   : > { %7167 = vmatmul.mubr.msk.f32.vlgmr.msra.gmra.mrb[8].mxu0 %vm1376_vm3, %v8677_v53 }
 0x40a   : > { %7200 = vmatpush3.msra.mxu0 %v8726_v42  ;;  %7201 = vmatprep.mubr.msk.f32.mxu0 %vm7900_vm0, %v7901_v1 }
 0x40b   : > { %7204 = vmatprep.subr.mxu0 %v7901_v1 }
 0x40d   : > { %7202 = vmatmul.mubr.f32.vlgmr.msra.gmra.mrb[10].mxu0 %v8786_v37 }
 0x40e   : > { %7205 = vmatpush3.msra.mxu0 %v4369_v27  ;;  %7206 = vmatprep.mubr.msk.f32.mxu0 %vm7900_vm0, %v7901_v1 }
 0x40f   : > { %7209 = vmatprep.subr.mxu0 %v7901_v1 }
 0x415   : > { %7207 = vmatmul.mubr.msk.f32.vlgmr.msra.gmra.mrb[10].mxu0 %vm1376_vm3, %v8625_v15 }
 0x416   : > { %7210 = vmatpush3.msra.mxu0 %v4366_v51  ;;  %7211 = vmatprep.mubr.msk.f32.mxu0 %vm7900_vm0, %v7901_v1 }
 0x417   : > { %7214 = vmatprep.subr.mxu0 %v7901_v1 }
 0x41d   : > { %7212 = vmatmul.mubr.f32.vlgmr.msra.gmra.mrb[10].mxu0 %v8771_v31 }
 0x41e   : > { %7215 = vmatpush3.msra.mxu0 %v8726_v42  ;;  %7216 = vmatprep.mubr.msk.f32.mxu0 %vm7900_vm0, %v7901_v1 }
 0x41f   : > { %7219 = vmatprep.subr.mxu0 %v7901_v1 }
 0x425   : > { %7217 = vmatmul.mubr.f32.vlgmr.msra.gmra.mrb[10].mxu0 %v8776_v33 }
 0x426   : > { %7220 = vmatpush3.msra.mxu0 %v4367_v3  ;;  %7221 = vmatprep.mubr.msk.f32.mxu0 %vm7900_vm0, %v7901_v1 }
 0x427   : > { %7224 = vmatprep.subr.mxu0 %v7901_v1 }
 0x42d   : > { %7222 = vmatmul.mubr.msk.f32.vlgmr.msra.gmra.mrb[10].mxu0 %vm1376_vm3, %v8625_v15 }
 0x42e   : > { %7225 = vmatpush3.msra.mxu0 %v8726_v42  ;;  %7226 = vmatprep.mubr.msk.f32.mxu0 %vm7900_vm0, %v7901_v1 }
 0x435   : > { %7227 = vmatmul.mubr.msk.f32.vlgmr.msra.gmra.mrb[10].mxu0 %vm1376_vm3, %v8625_v15 }
 0x458   : > { %v2463_v48 = vpop.f32.mrb[2].mxu0 }
 0x459   : > { %2467 = vst.msk [vmem:[#allocation3] sm:$0xff] %vm1376_vm3, %v2463_v48  ;;  %v7018_v49 = vpop.f32.mrb[3].mxu0 }
 0x460   : > { %v8818_v55 = vld [vmem:[#allocation3] sm:$0xff] }
 0x461   : > { %v2933_v58 = vsel %vm1376_vm3, %v8818_v55, 0  ;;  %v4736_v45 = vand.u32 4294901760, %v8818_v55 }
 0x462   : > { %v3001_v59 = vand.u32 4294901760, %v2933_v58 }
 0x463   : > { %v4813_v57 = vsub.f32 %v8818_v55, %v4736_v45 }
 0x464   : > { %v3002_v60 = vsub.f32 %v2933_v58, %v3001_v59 }
 0x465   : > { %v4814_v12 = vand.u32 4294901760, %v4813_v57 }
 0x466   : > { %v3003_v20 = vand.u32 4294901760, %v3002_v60 }
 0x467   : > { %v4815_v46 = vsub.f32 %v4813_v57, %v4814_v12 }
 0x468   : > { %v3004_v32 = vsub.f32 %v3002_v60, %v3003_v20 }
 0x469   : > { %v4816_v50 = vand.u32 4294901760, %v4815_v46 }
 0x46a   : > { %v3005_v22 = vand.u32 4294901760, %v3004_v32 }
 0x46c   : > { %7052 = vmatmul.mubr.f32.vlgmr.msra.gmra.mrb[4].mxu1 %v3005_v22 }
 0x46d   : > { %7055 = vmatpush3.msra.mxu1 %v8652_v35  ;;  %7056 = vmatprep.mubr.msk.f32.mxu1 %vm7900_vm0, %v7901_v1 }
 0x46e   : > { %7059 = vmatprep.subr.mxu1 %v7901_v1 }
 0x474   : > { %7057 = vmatmul.mubr.f32.vlgmr.msra.gmra.mrb[4].mxu1 %v3001_v59 }
 0x475   : > { %7060 = vmatpush3.msra.mxu1 %v8632_v34  ;;  %7061 = vmatprep.mubr.msk.f32.mxu1 %vm7900_vm0, %v7901_v1 }
 0x476   : > { %7064 = vmatprep.subr.mxu1 %v7901_v1 }
 0x47c   : > { %7062 = vmatmul.mubr.f32.vlgmr.msra.gmra.mrb[4].mxu1 %v3002_v60 }
 0x47d   : > { %7065 = vmatpush3.msk.msra.mxu1 %vm8583_vm4, %v7902_v62  ;;  %7066 = vmatprep.mubr.msk.f32.mxu1 %vm7900_vm0, %v7901_v1 }
 0x47e   : > { %7069 = vmatprep.subr.mxu1 %v7901_v1 }
 0x484   : > { %v8836_v21 = vpop.f32.mrb[4].mxu0  ;;  %7067 = vmatmul.mubr.f32.vlgmr.msra.gmra.mrb[4].mxu1 %v3003_v20 }
 0x485   : > { %7070 = vmatpush3.msra.mxu1 %v8640_v40  ;;  %v7048_v47 = vpop.f32.mrb[5].mxu0  ;;  %7071 = vmatprep.mubr.msk.f32.mxu1 %vm7900_vm0, %v7901_v1  ;;  %v2931_v63 = vsub.f32 %v8612_v6, %v8836_v21 }
 0x486   : > { %7074 = vmatprep.subr.mxu1 %v7901_v1 }
 0x487   : > { %v3382_v10 = vand.u32 2147483647, %v2931_v63 }
 0x48c   : > { %7072 = vmatmul.mubr.f32.vlgmr.msra.gmra.mrb[4].mxu1 %v3001_v59 }
 0x48d   : > { %7075 = vmatpush3.msk.msra.mxu1 %vm8583_vm4, %v7902_v62  ;;  %7076 = vmatprep.mubr.msk.f32.mxu1 %vm7900_vm0, %v7901_v1 }
 0x48e   : > { %7109 = vmatprep.subr.mxu1 %v7901_v1 }
 0x494   : > { %7077 = vmatmul.mubr.f32.vlgmr.msra.gmra.mrb[4].mxu1 %v3001_v59 }
 0x495   : > { %7110 = vmatpush3.msk.msra.mxu1 %vm8591_vm5, %v7902_v62  ;;  %7111 = vmatprep.mubr.msk.f32.mxu1 %vm7900_vm0, %v7901_v1 }
 0x496   : > { %7114 = vmatprep.subr.mxu1 %v7901_v1 }
 0x498   : > { %7112 = vmatmul.mubr.f32.vlgmr.msra.gmra.mrb[6].mxu1 %v3005_v22 }
 0x499   : > { %7115 = vmatpush3.msra.mxu1 %v8701_v38  ;;  %7116 = vmatprep.mubr.msk.f32.mxu1 %vm7900_vm0, %v7901_v1 }
 0x49a   : > { %7119 = vmatprep.subr.mxu1 %v7901_v1 }
 0x4a0   : > { %7117 = vmatmul.mubr.f32.vlgmr.msra.gmra.mrb[6].mxu1 %v3001_v59 }
 0x4a1   : > { %7120 = vmatpush3.msra.mxu1 %v8681_v56  ;;  %7121 = vmatprep.mubr.msk.f32.mxu1 %vm7900_vm0, %v7901_v1 }
 0x4a2   : > { %7124 = vmatprep.subr.mxu1 %v7901_v1 }
 0x4a8   : > { %7122 = vmatmul.mubr.f32.vlgmr.msra.gmra.mrb[6].mxu1 %v3002_v60 }
 0x4a9   : > { %7125 = vmatpush3.msk.msra.mxu1 %vm8591_vm5, %v7902_v62  ;;  %7126 = vmatprep.mubr.msk.f32.mxu1 %vm7900_vm0, %v7901_v1 }
 0x4aa   : > { %7129 = vmatprep.subr.mxu1 %v7901_v1 }
 0x4b0   : > { %v8868_v28 = vpop.f32.mrb[6].mxu0  ;;  %7127 = vmatmul.mubr.f32.vlgmr.msra.gmra.mrb[6].mxu1 %v3003_v20 }
 0x4b1   : > { %7130 = vmatpush3.msra.mxu1 %v8690_v14  ;;  %v7108_v39 = vpop.f32.mrb[7].mxu0  ;;  %7131 = vmatprep.mubr.msk.f32.mxu1 %vm7900_vm0, %v7901_v1  ;;  %v3832_v24 = vsub.f32 %v8612_v6, %v8868_v28 }
 0x4b2   : > { %7134 = vmatprep.subr.mxu1 %v7901_v1 }
 0x4b3   : > { %v4280_v16 = vand.u32 2147483647, %v3832_v24 }
 0x4b8   : > { %7132 = vmatmul.mubr.f32.vlgmr.msra.gmra.mrb[6].mxu1 %v3001_v59 }
 0x4b9   : > { %7135 = vmatpush3.msk.msra.mxu1 %vm8591_vm5, %v7902_v62  ;;  %7136 = vmatprep.mubr.msk.f32.mxu1 %vm7900_vm0, %v7901_v1 }
 0x4ba   : > { %7169 = vmatprep.subr.mxu1 %v7901_v1 }
 0x4c0   : > { %7137 = vmatmul.mubr.f32.vlgmr.msra.gmra.mrb[6].mxu1 %v3001_v59 }
 0x4c1   : > { %7170 = vmatpush3.msra.mxu1 %v4736_v45  ;;  %7171 = vmatprep.mubr.msk.f32.mxu1 %vm7900_vm0, %v7901_v1 }
 0x4c2   : > { %7174 = vmatprep.subr.mxu1 %v7901_v1 }
 0x4c4   : > { %7172 = vmatmul.mubr.f32.vlgmr.msra.gmra.mrb[8].mxu1 %v8745_v7 }
 0x4c5   : > { %7175 = vmatpush3.msra.mxu1 %v4816_v50  ;;  %7176 = vmatprep.mubr.msk.f32.mxu1 %vm7900_vm0, %v7901_v1 }
 0x4c6   : > { %7179 = vmatprep.subr.mxu1 %v7901_v1 }
 0x4cc   : > { %7177 = vmatmul.mubr.msk.f32.vlgmr.msra.gmra.mrb[8].mxu1 %vm1376_vm3, %v8677_v53 }
 0x4cd   : > { %7180 = vmatpush3.msra.mxu1 %v4813_v57  ;;  %7181 = vmatprep.mubr.msk.f32.mxu1 %vm7900_vm0, %v7901_v1 }
 0x4ce   : > { %7184 = vmatprep.subr.mxu1 %v7901_v1 }
 0x4d4   : > { %7182 = vmatmul.mubr.f32.vlgmr.msra.gmra.mrb[8].mxu1 %v8728_v43 }
 0x4d5   : > { %7185 = vmatpush3.msra.mxu1 %v4736_v45  ;;  %7186 = vmatprep.mubr.msk.f32.mxu1 %vm7900_vm0, %v7901_v1 }
 0x4d6   : > { %7189 = vmatprep.subr.mxu1 %v7901_v1 }
 0x4dc   : > { %v4730_v54 = vpop.f32.mrb[8].mxu0  ;;  %7187 = vmatmul.mubr.f32.vlgmr.msra.gmra.mrb[8].mxu1 %v8734_v52 }
 0x4dd   : > { %7190 = vmatpush3.msra.mxu1 %v4814_v12  ;;  %7191 = vmatprep.mubr.msk.f32.mxu1 %vm7900_vm0, %v7901_v1  ;;  %v7168_v61 = vpop.f32.mrb[9].mxu0  ;;  %v4734_v41 = vsub.f32 %v8612_v6, %v4730_v54 }
 0x4de   : > { %7194 = vmatprep.subr.mxu1 %v7901_v1 }
 0x4e4   : > { %7192 = vmatmul.mubr.msk.f32.vlgmr.msra.gmra.mrb[8].mxu1 %vm1376_vm3, %v8677_v53 }
 0x4e5   : > { %7195 = vmatpush3.msra.mxu1 %v4736_v45  ;;  %7196 = vmatprep.mubr.msk.f32.mxu1 %vm7900_vm0, %v7901_v1 }
 0x4e6   : > { %7229 = vmatprep.subr.mxu1 %v7901_v1 }
 0x4ec   : > { %7197 = vmatmul.mubr.msk.f32.vlgmr.msra.gmra.mrb[8].mxu1 %vm1376_vm3, %v8677_v53  ;;  %v5182_v53 = vand.u32 2147483647, %v4734_v41 }
 0x4ed   : > { %7230 = vmatpush3.msra.mxu1 %v4736_v45  ;;  %7231 = vmatprep.mubr.msk.f32.mxu1 %vm7900_vm0, %v7901_v1 }
 0x4ee   : > { %7234 = vmatprep.subr.mxu1 %v7901_v1 }
 0x4f0   : > { %7232 = vmatmul.mubr.f32.vlgmr.msra.gmra.mrb[10].mxu1 %v8786_v37 }
 0x4f1   : > { %7235 = vmatpush3.msra.mxu1 %v4816_v50  ;;  %7236 = vmatprep.mubr.msk.f32.mxu1 %vm7900_vm0, %v7901_v1 }
 0x4f2   : > { %7239 = vmatprep.subr.mxu1 %v7901_v1 }
 0x4f8   : > { %7237 = vmatmul.mubr.msk.f32.vlgmr.msra.gmra.mrb[10].mxu1 %vm1376_vm3, %v8625_v15 }
 0x4f9   : > { %7240 = vmatpush3.msra.mxu1 %v4813_v57  ;;  %7241 = vmatprep.mubr.msk.f32.mxu1 %vm7900_vm0, %v7901_v1 }
 0x4fa   : > { %7244 = vmatprep.subr.mxu1 %v7901_v1 }
 0x500   : > { %7242 = vmatmul.mubr.f32.vlgmr.msra.gmra.mrb[10].mxu1 %v8771_v31 }
 0x501   : > { %7245 = vmatpush3.msra.mxu1 %v4736_v45  ;;  %7246 = vmatprep.mubr.msk.f32.mxu1 %vm7900_vm0, %v7901_v1 }
 0x502   : > { %7249 = vmatprep.subr.mxu1 %v7901_v1 }
 0x508   : > { %v5632_v62 = vpop.f32.mrb[10].mxu0  ;;  %7247 = vmatmul.mubr.f32.vlgmr.msra.gmra.mrb[10].mxu1 %v8776_v33 }
 0x509   : > { %7250 = vmatpush3.msra.mxu1 %v4814_v12  ;;  %7251 = vmatprep.mubr.msk.f32.mxu1 %vm7900_vm0, %v7901_v1  ;;  %v7228_v25 = vpop.f32.mrb[11].mxu0  ;;  %v5636_v13 = vsub.f32 %v8612_v6, %v5632_v62 }
 0x50a   : > { %7254 = vmatprep.subr.mxu1 %v7901_v1 }
 0x50b   : > { %v6084_v52 = vand.u32 2147483647, %v5636_v13 }
 0x510   : > { %7252 = vmatmul.mubr.msk.f32.vlgmr.msra.gmra.mrb[10].mxu1 %vm1376_vm3, %v8625_v15 }
 0x511   : > { %7255 = vmatpush3.msra.mxu1 %v4736_v45  ;;  %7256 = vmatprep.mubr.msk.f32.mxu1 %vm7900_vm0, %v7901_v1 }
 0x518   : > { %7257 = vmatmul.mubr.msk.f32.vlgmr.msra.gmra.mrb[10].mxu1 %vm1376_vm3, %v8625_v15 }
 0x567   : > { %v3377_v2 = vpop.f32.mrb[4].mxu1 }
 0x568   : > { %v3381_v8 = vsub.f32 %v8818_v55, %v3377_v2  ;;  %v7078_v9 = vpop.f32.mrb[5].mxu1 }
 0x56a   : > { %v3383_v19 = vand.u32 2147483647, %v3381_v8 }
 0x56c   : > { %v3384_v23 = vsub.f32 %v3382_v10, %v3383_v19 }
 0x56e   : > { %v3385_v17 = vmul.f32 %v3384_v23, %v3384_v23 }
 0x593   : > { %v4275_v26 = vpop.f32.mrb[6].mxu1 }
 0x594   : > { %v4279_v11 = vsub.f32 %v8818_v55, %v4275_v26  ;;  %v7138_v1 = vpop.f32.mrb[7].mxu1 }
 0x596   : > { %v4281_v34 = vand.u32 2147483647, %v4279_v11 }
 0x598   : > { %v4282_v15 = vsub.f32 %v4280_v16, %v4281_v34 }
 0x59a   : > { %v4283_v40 = vmul.f32 %v4282_v15, %v4282_v15 }
 0x59c   : > { %v4284_v18 = vadd.f32 %v4283_v40, %v3385_v17 }
 0x5bf   : > { %v5177_v44 = vpop.f32.mrb[8].mxu1 }
 0x5c0   : > { %v5181_v35 = vsub.f32 %v8818_v55, %v5177_v44  ;;  %v7198_v0 = vpop.f32.mrb[9].mxu1 }
 0x5c2   : > { %v5183_v56 = vand.u32 2147483647, %v5181_v35 }
 0x5c4   : > { %v5184_v14 = vsub.f32 %v5182_v53, %v5183_v56 }
 0x5c6   : > { %v5185_v29 = vmul.f32 %v5184_v14, %v5184_v14 }
 0x5c8   : > { %v5186_v38 = vadd.f32 %v5185_v29, %v4284_v18 }
 0x5eb   : > { %v6079_v42 = vpop.f32.mrb[10].mxu1 }
 0x5ec   : > { %v6083_v43 = vsub.f32 %v8818_v55, %v6079_v42  ;;  %v7258_v51 = vpop.f32.mrb[11].mxu1 }
 0x5ee   : > { %v6085_v3 = vand.u32 2147483647, %v6083_v43 }
 0x5f0   : > { %v6086_v4 = vsub.f32 %v6084_v52, %v6085_v3 }
 0x5f2   : > { %v6087_v5 = vmul.f32 %v6086_v4, %v6086_v4 }
 0x5f4   : > { %v6088_v7 = vadd.f32 %v6087_v5, %v5186_v38 }
 0x5f6   : > { %v6089_v27 = vsel %vm1376_vm3, %v6088_v7, 0.0 }
 0x5f7   : > { %6090 = vadd.xlane.f32.xlu0 %v6089_v27 }
 0x684   : > { %v6091_v30 = vpop.xlane.xlu0 %6090 }
 0x685   : > { %v6092_v31 = vrot.slane %v6091_v30, 4 }
 0x687   : > { %v6093_v33 = vadd.f32 %v6092_v31, %v6091_v30 }
 0x689   : > { %v6094_v36 = vrot.slane %v6093_v33, 2 }
 0x68b   : > { %v6095_v6 = vadd.f32 %v6094_v36, %v6093_v33 }
 0x68d   : > { %v6096_v37 = vrot.slane %v6095_v6, 1 }
 0x68f   : > { %v6097_v48 = vadd.f32 %v6096_v37, %v6095_v6 }
 0x691   : > { %7672 = vpush %v6097_v48 }
 0x6c2   : > { %s7673_s5 = spop %7672 }
 0x6c3   : > { %s6099_s25 = smul.f32 0.015625, %s7673_s5 }
 0x6c5   : > { %v6100_v49 = vstv %s6099_s25 }
 0x6c6   : > { %6101 = vst [vmem:[%s274_s26] sm:$0x1] %v6100_v49 }
 0x6c7   : > { %7820 = shalt.err (!%p7817_p11)
}
 0x6c8   : > { %s7821_s14 = scalar_lea.hbm %s8951_s12, 16  ;;  %s7825_s13 = scalar_lea.hbm %s9004_s4, 32 }
 0x6c9   : > { %p7822_p1 = scmp.ne.s32.totalorder %s8951_s12, %s7821_s14  ;;  %p7826_p4 = scmp.lt.u32.totalorder %s8951_s12, %s9004_s4 }
 0x6ca   : > { %p7827_p6 = scmp.lt.u32.totalorder %s7825_s13, %s7821_s14  ;;  %p7829_p0 = scmp.lt.u32.totalorder %s7821_s14, %s8951_s12 }
 0x6cb   : > { %p7823_p5 = pnand %p7822_p1, %p9021_p3 }
 0x6cc   : > { %p7828_p8 = por %p7827_p6, %p7826_p4 }
 0x6cd   : > { %p7824_p2 = pneg %p7823_p5 }
 0x6ce   : > { %p7830_p12 = por %p7829_p0, %p7828_p8 }
 0x6d0   : > { %p7831_p13 = pnand %p7830_p12, %p7824_p2 }
 0x6d2   : > { %7834 = shalt.err (!%p7831_p13)
}
 0x6d3   : > { %7678 = dma.vmem_to_hbm [thread:$0]  (%p9021_p3), %s8953_s9, 16, %s8951_s12, %s6103_s24  }
 0x6d4 PF: > { %s6127_s5 = sand.u32 1, %s7873_s15   ;;  %p9022_p7 = scmp.ne.s32.totalorder %s9011_s30, 0 }
 0x6d5   : > { %p9023_p10 = scmp.ge.s32.totalorder %s7893_s20, 2  ;;  %s6128_s25 = scalar_lea.sflag [#allocation6], %s6127_s5 }
 0x6d7   : > { %p7688_p9 = pnand %p9023_p10, %p9022_p7 }
 0x6d9   : > { %7868 = dma.done.wait (!%p7688_p9), %s6128_s25, 16  }
 0x6da   : > { %7870 = vsyncadd (!%p7688_p9), %s6128_s25, 4294967280  ;;  %s23_s20 = sadd.s32 1, %s7893_s20   ;;  %s9024_s15 = smov %s7877_s16 }
 0x6db   : > { %p20_p11 = scmp.ge.s32.totalorder %s23_s20, 4   ;;  %s9025_s16 = smov %s7881_s17 }
 0x6dc   : > { %s9026_s17 = smov %s7985_s29  ;;  %s9027_s18 = smov %s7889_s19 }
 0x6dd   : > { %s9028_s19 = smov %s9030_s23  ;;  %22 = sbr.rel (!%p20_p11) target bundleno = 8 (0x8), region = 94 }
 0x6e4   :  { %6132 = vsyncpa [#allocation5], 1 }
 0x6e5   :  { %6134 = vsyncpa [#allocation5 + $0x1], 1 }
 0x6e6   :  { %6135 = vsyncpa [#allocation8], 1 }
 0x6e7   :  { %6137 = vsyncpa [#allocation8 + $0x1], 1 }
 0x6e8   :  { %6138 = vsyncpa [#allocation6], 1 }
 0x6e9   :  { %6140 = vsyncpa [#allocation6 + $0x1], 1 }

</bundles_post_ra>
